<compile_context>
chip_gen: v6e
topology: v6e:2x2x1
jax: 0.10.0
libtpu: 0.0.40
codegen_flags: <defaults>
</compile_context>

<pallas_src>
import functools

import jax
import jax.numpy as jnp
from jax.experimental import pallas as pl
from jax.experimental.pallas import tpu as pltpu


def _lstm_kernel(x_ref, wih_ref, whh_ref, small_ref, out_ref,
                 *, seq_len, batch, hidden_pad):
    """Whole LSTM forward in one kernel invocation.

    x_ref     : (S*B, 4? no: S*B, D) time-major flattened input, VMEM resident
    wih_ref   : (D, 4Hp)  input->gates weight (gate order i,f,o,g; H padded)
    whh_ref   : (Hp, 4Hp) hidden->gates weight (gate order i,f,o,g; H padded)
    small_ref : (2, 4Hp)  row0 = combined bias; row1[:Hp] = fc weight,
                          row1[Hp] = fc bias
    out_ref   : (B, 1)    prediction
    """
    S, B, Hp = seq_len, batch, hidden_pad

    bias = small_ref[0:1, :]                  # (1, 4Hp)
    w_fc = small_ref[1:2, :Hp]                # (1, Hp)
    b_fc = small_ref[1:2, Hp:Hp + 1]          # (1, 1)

    # One fused input projection for all time steps; sits entirely off the
    # serial h-dependency chain.
    proj = jnp.dot(x_ref[...], wih_ref[...],
                   preferred_element_type=jnp.float32) + bias   # (S*B, 4Hp)

    # Hoisted: one VMEM load of W_hh for the whole recurrence.
    w_hh = whh_ref[...]                       # (Hp, 4Hp)

    h = jnp.zeros((B, Hp), jnp.float32)
    c = jnp.zeros((B, Hp), jnp.float32)

    # Recurrence: statically unrolled (S is a small, static trip count).
    # Per-step critical path: one (B,Hp)@(Hp,4Hp) MXU matmul + gate elementwise.
    for t in range(S):
        gates = proj[t * B:(t + 1) * B, :] + jnp.dot(
            h, w_hh, preferred_element_type=jnp.float32)        # (B, 4Hp)
        # Gate layout (permuted in wrapper): i | f | o | g
        sig = jax.nn.sigmoid(gates[:, :3 * Hp])                 # i, f, o in one call
        i_g = sig[:, 0 * Hp:1 * Hp]
        f_g = sig[:, 1 * Hp:2 * Hp]
        o_g = sig[:, 2 * Hp:3 * Hp]
        g_g = jnp.tanh(gates[:, 3 * Hp:4 * Hp])
        c = f_g * c + i_g * g_g
        h = o_g * jnp.tanh(c)

    # fc(h_last): VPU multiply + lane reduction instead of an N=1 MXU pass.
    # Padded h lanes are exactly 0 and the padded fc weight lanes are 0.
    out_ref[...] = jnp.sum(h * w_fc, axis=-1, keepdims=True) + b_fc


def lstm_model_forward(x, params):
    """x: (batch, seq, input_dim) float32  ->  (batch, 1) float32."""
    B, S, D = x.shape
    H = params["w_hh"].shape[1]                      # w_hh is (4H, H)
    Hp = ((H + 127) // 128) * 128                    # lane-aligned hidden dim
    Bp = max(8, ((B + 7) // 8) * 8)                  # sublane-aligned batch

    # Pad batch; flatten time-major so the kernel's per-step slice is a
    # contiguous, sublane-aligned row block.
    x_p = x if Bp == B else jnp.pad(x, ((0, Bp - B), (0, 0), (0, 0)))
    x_tm = jnp.transpose(x_p, (1, 0, 2)).reshape(S * Bp, D)

    # Gate permutation torch(i,f,g,o) -> kernel(i,f,o,g) + per-gate pad H -> Hp.
    def pack_gates(w):
        i, f, g, o = w[0:H], w[H:2 * H], w[2 * H:3 * H], w[3 * H:4 * H]
        pad = ((0, Hp - H),) + ((0, 0),) * (w.ndim - 1)
        return jnp.concatenate([jnp.pad(blk, pad) for blk in (i, f, o, g)],
                               axis=0)

    w_ih_p = pack_gates(params["w_ih"])              # (4Hp, D)
    w_hh_p = pack_gates(params["w_hh"])              # (4Hp, H)
    w_hh_p = jnp.pad(w_hh_p, ((0, 0), (0, Hp - H)))  # (4Hp, Hp)
    b_p = pack_gates(params["b_ih"] + params["b_hh"])  # (4Hp,)

    w_ih_t = w_ih_p.T                                # (D, 4Hp)
    w_hh_t = w_hh_p.T                                # (Hp, 4Hp)

    # Pack the small operands into one VMEM tile (one prologue DMA).
    w_fc_pad = jnp.pad(params["w_fc"].reshape(-1), (0, Hp - H))  # (Hp,)
    small = jnp.zeros((2, 4 * Hp), jnp.float32)
    small = small.at[0, :].set(b_p)
    small = small.at[1, :Hp].set(w_fc_pad)
    small = small.at[1, Hp].set(params["b_fc"][0])

    kernel = functools.partial(_lstm_kernel, seq_len=S, batch=Bp, hidden_pad=Hp)

    out = pl.pallas_call(
        kernel,
        out_shape=jax.ShapeDtypeStruct((Bp, 1), jnp.float32),
        grid=(1,),
        in_specs=[
            pl.BlockSpec((S * Bp, D), lambda i: (0, 0)),
            pl.BlockSpec((D, 4 * Hp), lambda i: (0, 0)),
            pl.BlockSpec((Hp, 4 * Hp), lambda i: (0, 0)),
            pl.BlockSpec((2, 4 * Hp), lambda i: (0, 0)),
        ],
        out_specs=pl.BlockSpec((Bp, 1), lambda i: (0, 0)),
        compiler_params=pltpu.CompilerParams(
            dimension_semantics=("arbitrary",),
        ),
    )(x_tm, w_ih_t, w_hh_t, small)

    return out if Bp == B else out[:B]


def lstm_model_reference(x, params):
    """Pure-JAX reference (lax.scan), matches PyTorch nn.LSTM semantics."""
    B, S, D = x.shape
    H = params["w_hh"].shape[1]
    w_ih_t = params["w_ih"].T
    w_hh_t = params["w_hh"].T
    b = params["b_ih"] + params["b_hh"]

    def step(carry, x_t):
        h, c = carry
        gates = x_t @ w_ih_t + h @ w_hh_t + b
        i = jax.nn.sigmoid(gates[:, 0 * H:1 * H])
        f = jax.nn.sigmoid(gates[:, 1 * H:2 * H])
        g = jnp.tanh(gates[:, 2 * H:3 * H])
        o = jax.nn.sigmoid(gates[:, 3 * H:4 * H])
        c = f * c + i * g
        h = o * jnp.tanh(c)
        return (h, c), None

    h0 = jnp.zeros((B, H), jnp.float32)
    c0 = jnp.zeros((B, H), jnp.float32)
    (h_last, _), _ = jax.lax.scan(step, (h0, c0), jnp.transpose(x, (1, 0, 2)))
    return h_last @ params["w_fc"].T + params["b_fc"]


def init_params(key, input_dim, hidden_dim):
    """Deterministic init mirroring PyTorch's U(-1/sqrt(H), 1/sqrt(H)) shapes."""
    ks = jax.random.split(key, 6)
    s = 1.0 / jnp.sqrt(hidden_dim)
    return {
        "w_ih": jax.random.uniform(ks[0], (4 * hidden_dim, input_dim), jnp.float32, -s, s),
        "w_hh": jax.random.uniform(ks[1], (4 * hidden_dim, hidden_dim), jnp.float32, -s, s),
        "b_ih": jax.random.uniform(ks[2], (4 * hidden_dim,), jnp.float32, -s, s),
        "b_hh": jax.random.uniform(ks[3], (4 * hidden_dim,), jnp.float32, -s, s),
        "w_fc": jax.random.uniform(ks[4], (1, hidden_dim), jnp.float32, -s, s),
        "b_fc": jax.random.uniform(ks[5], (1,), jnp.float32, -s, s),
    }


if __name__ == "__main__":
    batch, seq, input_dim, hidden_dim = 8, 8, 8, 64

    key = jax.random.PRNGKey(0)
    k_x, k_p = jax.random.split(key)
    x = jax.random.normal(k_x, (batch, seq, input_dim), jnp.float32)
    params = init_params(k_p, input_dim, hidden_dim)

    out = jax.block_until_ready(lstm_model_forward(x, params))
    ref = jax.block_until_ready(lstm_model_reference(x, params))

    assert out.shape == (batch, 1)
    assert jnp.allclose(out, ref, atol=1e-5, rtol=1e-5), (out, ref)
    print("KERNEL_OK")
</pallas_src>

<mosaic_0001>
module attributes {stable_mosaic.version = 11 : i64} {
  func.func @_lstm_kernel(%arg0: i32, %arg1: memref<64x8xf32, #tpu.memory_space<vmem>>, %arg2: memref<8x512xf32, #tpu.memory_space<vmem>>, %arg3: memref<128x512xf32, #tpu.memory_space<vmem>>, %arg4: memref<2x512xf32, #tpu.memory_space<vmem>>, %arg5: memref<8x1xf32, #tpu.memory_space<vmem>>) attributes {dimension_semantics = [#tpu.dimension_semantics<arbitrary>], iteration_bounds = array<i64: 1>, scalar_prefetch = 0 : i64, scratch_operands = 0 : i64, tpu.core_type = #tpu.core_type<tc>, window_params = [{pipeline_mode = #tpu.pipeline_mode<synchronous>, transform_indices = @transform_0, window_bounds = array<i64: 64, 8>}, {pipeline_mode = #tpu.pipeline_mode<synchronous>, transform_indices = @transform_1, window_bounds = array<i64: 8, 512>}, {pipeline_mode = #tpu.pipeline_mode<synchronous>, transform_indices = @transform_2, window_bounds = array<i64: 128, 512>}, {pipeline_mode = #tpu.pipeline_mode<synchronous>, transform_indices = @transform_3, window_bounds = array<i64: 2, 512>}, {pipeline_mode = #tpu.pipeline_mode<synchronous>, transform_indices = @transform_4, window_bounds = array<i64: 8, 1>}]} {
    %c0 = arith.constant 0 : index
    %c0_0 = arith.constant 0 : index
    %0 = vector.load %arg4[%c0, %c0_0] : memref<2x512xf32, #tpu.memory_space<vmem>>, vector<1x512xf32>
    %c1 = arith.constant 1 : index
    %c0_1 = arith.constant 0 : index
    %1 = vector.load %arg4[%c1, %c0_1] : memref<2x512xf32, #tpu.memory_space<vmem>>, vector<1x128xf32>
    %c1_2 = arith.constant 1 : index
    %c128 = arith.constant 128 : index
    %2 = vector.load %arg4[%c1_2, %c128] : memref<2x512xf32, #tpu.memory_space<vmem>>, vector<1x1xf32>
    %c0_3 = arith.constant 0 : index
    %c0_4 = arith.constant 0 : index
    %3 = vector.load %arg1[%c0_3, %c0_4] : memref<64x8xf32, #tpu.memory_space<vmem>>, vector<64x8xf32>
    %c0_5 = arith.constant 0 : index
    %c0_6 = arith.constant 0 : index
    %4 = vector.load %arg2[%c0_5, %c0_6] : memref<8x512xf32, #tpu.memory_space<vmem>>, vector<8x512xf32>
    %cst = arith.constant dense<0.000000e+00> : vector<64x512xf32>
    %5 = tpu.matmul %3, %4, %cst {dimension_numbers = #tpu.dot_dimension_numbers<[1], [0], [0], [1], [0, 0, 1, 1], [], []>} : vector<64x8xf32>, vector<8x512xf32>, vector<64x512xf32> -> vector<64x512xf32>
    %6 = vector.broadcast %0 : vector<1x512xf32> to vector<64x512xf32>
    %7 = arith.addf %5, %6 : vector<64x512xf32>
    %c0_7 = arith.constant 0 : index
    %c0_8 = arith.constant 0 : index
    %8 = vector.load %arg3[%c0_7, %c0_8] : memref<128x512xf32, #tpu.memory_space<vmem>>, vector<128x512xf32>
    %cst_9 = arith.constant 0.000000e+00 : f32
    %9 = vector.broadcast %cst_9 : f32 to vector<8x128xf32>
    %cst_10 = arith.constant 0.000000e+00 : f32
    %10 = vector.broadcast %cst_10 : f32 to vector<8x128xf32>
    %11 = vector.extract_strided_slice %7 {offsets = [0, 0], sizes = [8, 512], strides = [1, 1]} : vector<64x512xf32> to vector<8x512xf32>
    %cst_11 = arith.constant dense<0.000000e+00> : vector<8x512xf32>
    %12 = tpu.matmul %9, %8, %cst_11 {dimension_numbers = #tpu.dot_dimension_numbers<[1], [0], [0], [1], [0, 0, 1, 1], [], []>} : vector<8x128xf32>, vector<128x512xf32>, vector<8x512xf32> -> vector<8x512xf32>
    %13 = arith.addf %11, %12 : vector<8x512xf32>
    %14 = vector.extract_strided_slice %13 {offsets = [0, 0], sizes = [8, 384], strides = [1, 1]} : vector<8x512xf32> to vector<8x384xf32>
    %15 = arith.negf %14 : vector<8x384xf32>
    %16 = math.exp %15 : vector<8x384xf32>
    %cst_12 = arith.constant 1.000000e+00 : f32
    %17 = vector.broadcast %cst_12 : f32 to vector<8x384xf32>
    %18 = arith.addf %17, %16 : vector<8x384xf32>
    %19 = arith.divf %17, %18 : vector<8x384xf32>
    %20 = vector.extract_strided_slice %19 {offsets = [0, 0], sizes = [8, 128], strides = [1, 1]} : vector<8x384xf32> to vector<8x128xf32>
    %21 = vector.extract_strided_slice %19 {offsets = [0, 128], sizes = [8, 128], strides = [1, 1]} : vector<8x384xf32> to vector<8x128xf32>
    %22 = vector.extract_strided_slice %19 {offsets = [0, 256], sizes = [8, 128], strides = [1, 1]} : vector<8x384xf32> to vector<8x128xf32>
    %23 = vector.extract_strided_slice %13 {offsets = [0, 384], sizes = [8, 128], strides = [1, 1]} : vector<8x512xf32> to vector<8x128xf32>
    %24 = math.tanh %23 : vector<8x128xf32>
    %25 = arith.mulf %21, %10 : vector<8x128xf32>
    %26 = arith.mulf %20, %24 : vector<8x128xf32>
    %27 = arith.addf %25, %26 : vector<8x128xf32>
    %28 = math.tanh %27 : vector<8x128xf32>
    %29 = arith.mulf %22, %28 : vector<8x128xf32>
    %30 = vector.extract_strided_slice %7 {offsets = [8, 0], sizes = [8, 512], strides = [1, 1]} : vector<64x512xf32> to vector<8x512xf32>
    %cst_13 = arith.constant dense<0.000000e+00> : vector<8x512xf32>
    %31 = tpu.matmul %29, %8, %cst_13 {dimension_numbers = #tpu.dot_dimension_numbers<[1], [0], [0], [1], [0, 0, 1, 1], [], []>} : vector<8x128xf32>, vector<128x512xf32>, vector<8x512xf32> -> vector<8x512xf32>
    %32 = arith.addf %30, %31 : vector<8x512xf32>
    %33 = vector.extract_strided_slice %32 {offsets = [0, 0], sizes = [8, 384], strides = [1, 1]} : vector<8x512xf32> to vector<8x384xf32>
    %34 = arith.negf %33 : vector<8x384xf32>
    %35 = math.exp %34 : vector<8x384xf32>
    %cst_14 = arith.constant 1.000000e+00 : f32
    %36 = vector.broadcast %cst_14 : f32 to vector<8x384xf32>
    %37 = arith.addf %36, %35 : vector<8x384xf32>
    %38 = arith.divf %36, %37 : vector<8x384xf32>
    %39 = vector.extract_strided_slice %38 {offsets = [0, 0], sizes = [8, 128], strides = [1, 1]} : vector<8x384xf32> to vector<8x128xf32>
    %40 = vector.extract_strided_slice %38 {offsets = [0, 128], sizes = [8, 128], strides = [1, 1]} : vector<8x384xf32> to vector<8x128xf32>
    %41 = vector.extract_strided_slice %38 {offsets = [0, 256], sizes = [8, 128], strides = [1, 1]} : vector<8x384xf32> to vector<8x128xf32>
    %42 = vector.extract_strided_slice %32 {offsets = [0, 384], sizes = [8, 128], strides = [1, 1]} : vector<8x512xf32> to vector<8x128xf32>
    %43 = math.tanh %42 : vector<8x128xf32>
    %44 = arith.mulf %40, %27 : vector<8x128xf32>
    %45 = arith.mulf %39, %43 : vector<8x128xf32>
    %46 = arith.addf %44, %45 : vector<8x128xf32>
    %47 = math.tanh %46 : vector<8x128xf32>
    %48 = arith.mulf %41, %47 : vector<8x128xf32>
    %49 = vector.extract_strided_slice %7 {offsets = [16, 0], sizes = [8, 512], strides = [1, 1]} : vector<64x512xf32> to vector<8x512xf32>
    %cst_15 = arith.constant dense<0.000000e+00> : vector<8x512xf32>
    %50 = tpu.matmul %48, %8, %cst_15 {dimension_numbers = #tpu.dot_dimension_numbers<[1], [0], [0], [1], [0, 0, 1, 1], [], []>} : vector<8x128xf32>, vector<128x512xf32>, vector<8x512xf32> -> vector<8x512xf32>
    %51 = arith.addf %49, %50 : vector<8x512xf32>
    %52 = vector.extract_strided_slice %51 {offsets = [0, 0], sizes = [8, 384], strides = [1, 1]} : vector<8x512xf32> to vector<8x384xf32>
    %53 = arith.negf %52 : vector<8x384xf32>
    %54 = math.exp %53 : vector<8x384xf32>
    %cst_16 = arith.constant 1.000000e+00 : f32
    %55 = vector.broadcast %cst_16 : f32 to vector<8x384xf32>
    %56 = arith.addf %55, %54 : vector<8x384xf32>
    %57 = arith.divf %55, %56 : vector<8x384xf32>
    %58 = vector.extract_strided_slice %57 {offsets = [0, 0], sizes = [8, 128], strides = [1, 1]} : vector<8x384xf32> to vector<8x128xf32>
    %59 = vector.extract_strided_slice %57 {offsets = [0, 128], sizes = [8, 128], strides = [1, 1]} : vector<8x384xf32> to vector<8x128xf32>
    %60 = vector.extract_strided_slice %57 {offsets = [0, 256], sizes = [8, 128], strides = [1, 1]} : vector<8x384xf32> to vector<8x128xf32>
    %61 = vector.extract_strided_slice %51 {offsets = [0, 384], sizes = [8, 128], strides = [1, 1]} : vector<8x512xf32> to vector<8x128xf32>
    %62 = math.tanh %61 : vector<8x128xf32>
    %63 = arith.mulf %59, %46 : vector<8x128xf32>
    %64 = arith.mulf %58, %62 : vector<8x128xf32>
    %65 = arith.addf %63, %64 : vector<8x128xf32>
    %66 = math.tanh %65 : vector<8x128xf32>
    %67 = arith.mulf %60, %66 : vector<8x128xf32>
    %68 = vector.extract_strided_slice %7 {offsets = [24, 0], sizes = [8, 512], strides = [1, 1]} : vector<64x512xf32> to vector<8x512xf32>
    %cst_17 = arith.constant dense<0.000000e+00> : vector<8x512xf32>
    %69 = tpu.matmul %67, %8, %cst_17 {dimension_numbers = #tpu.dot_dimension_numbers<[1], [0], [0], [1], [0, 0, 1, 1], [], []>} : vector<8x128xf32>, vector<128x512xf32>, vector<8x512xf32> -> vector<8x512xf32>
    %70 = arith.addf %68, %69 : vector<8x512xf32>
    %71 = vector.extract_strided_slice %70 {offsets = [0, 0], sizes = [8, 384], strides = [1, 1]} : vector<8x512xf32> to vector<8x384xf32>
    %72 = arith.negf %71 : vector<8x384xf32>
    %73 = math.exp %72 : vector<8x384xf32>
    %cst_18 = arith.constant 1.000000e+00 : f32
    %74 = vector.broadcast %cst_18 : f32 to vector<8x384xf32>
    %75 = arith.addf %74, %73 : vector<8x384xf32>
    %76 = arith.divf %74, %75 : vector<8x384xf32>
    %77 = vector.extract_strided_slice %76 {offsets = [0, 0], sizes = [8, 128], strides = [1, 1]} : vector<8x384xf32> to vector<8x128xf32>
    %78 = vector.extract_strided_slice %76 {offsets = [0, 128], sizes = [8, 128], strides = [1, 1]} : vector<8x384xf32> to vector<8x128xf32>
    %79 = vector.extract_strided_slice %76 {offsets = [0, 256], sizes = [8, 128], strides = [1, 1]} : vector<8x384xf32> to vector<8x128xf32>
    %80 = vector.extract_strided_slice %70 {offsets = [0, 384], sizes = [8, 128], strides = [1, 1]} : vector<8x512xf32> to vector<8x128xf32>
    %81 = math.tanh %80 : vector<8x128xf32>
    %82 = arith.mulf %78, %65 : vector<8x128xf32>
    %83 = arith.mulf %77, %81 : vector<8x128xf32>
    %84 = arith.addf %82, %83 : vector<8x128xf32>
    %85 = math.tanh %84 : vector<8x128xf32>
    %86 = arith.mulf %79, %85 : vector<8x128xf32>
    %87 = vector.extract_strided_slice %7 {offsets = [32, 0], sizes = [8, 512], strides = [1, 1]} : vector<64x512xf32> to vector<8x512xf32>
    %cst_19 = arith.constant dense<0.000000e+00> : vector<8x512xf32>
    %88 = tpu.matmul %86, %8, %cst_19 {dimension_numbers = #tpu.dot_dimension_numbers<[1], [0], [0], [1], [0, 0, 1, 1], [], []>} : vector<8x128xf32>, vector<128x512xf32>, vector<8x512xf32> -> vector<8x512xf32>
    %89 = arith.addf %87, %88 : vector<8x512xf32>
    %90 = vector.extract_strided_slice %89 {offsets = [0, 0], sizes = [8, 384], strides = [1, 1]} : vector<8x512xf32> to vector<8x384xf32>
    %91 = arith.negf %90 : vector<8x384xf32>
    %92 = math.exp %91 : vector<8x384xf32>
    %cst_20 = arith.constant 1.000000e+00 : f32
    %93 = vector.broadcast %cst_20 : f32 to vector<8x384xf32>
    %94 = arith.addf %93, %92 : vector<8x384xf32>
    %95 = arith.divf %93, %94 : vector<8x384xf32>
    %96 = vector.extract_strided_slice %95 {offsets = [0, 0], sizes = [8, 128], strides = [1, 1]} : vector<8x384xf32> to vector<8x128xf32>
    %97 = vector.extract_strided_slice %95 {offsets = [0, 128], sizes = [8, 128], strides = [1, 1]} : vector<8x384xf32> to vector<8x128xf32>
    %98 = vector.extract_strided_slice %95 {offsets = [0, 256], sizes = [8, 128], strides = [1, 1]} : vector<8x384xf32> to vector<8x128xf32>
    %99 = vector.extract_strided_slice %89 {offsets = [0, 384], sizes = [8, 128], strides = [1, 1]} : vector<8x512xf32> to vector<8x128xf32>
    %100 = math.tanh %99 : vector<8x128xf32>
    %101 = arith.mulf %97, %84 : vector<8x128xf32>
    %102 = arith.mulf %96, %100 : vector<8x128xf32>
    %103 = arith.addf %101, %102 : vector<8x128xf32>
    %104 = math.tanh %103 : vector<8x128xf32>
    %105 = arith.mulf %98, %104 : vector<8x128xf32>
    %106 = vector.extract_strided_slice %7 {offsets = [40, 0], sizes = [8, 512], strides = [1, 1]} : vector<64x512xf32> to vector<8x512xf32>
    %cst_21 = arith.constant dense<0.000000e+00> : vector<8x512xf32>
    %107 = tpu.matmul %105, %8, %cst_21 {dimension_numbers = #tpu.dot_dimension_numbers<[1], [0], [0], [1], [0, 0, 1, 1], [], []>} : vector<8x128xf32>, vector<128x512xf32>, vector<8x512xf32> -> vector<8x512xf32>
    %108 = arith.addf %106, %107 : vector<8x512xf32>
    %109 = vector.extract_strided_slice %108 {offsets = [0, 0], sizes = [8, 384], strides = [1, 1]} : vector<8x512xf32> to vector<8x384xf32>
    %110 = arith.negf %109 : vector<8x384xf32>
    %111 = math.exp %110 : vector<8x384xf32>
    %cst_22 = arith.constant 1.000000e+00 : f32
    %112 = vector.broadcast %cst_22 : f32 to vector<8x384xf32>
    %113 = arith.addf %112, %111 : vector<8x384xf32>
    %114 = arith.divf %112, %113 : vector<8x384xf32>
    %115 = vector.extract_strided_slice %114 {offsets = [0, 0], sizes = [8, 128], strides = [1, 1]} : vector<8x384xf32> to vector<8x128xf32>
    %116 = vector.extract_strided_slice %114 {offsets = [0, 128], sizes = [8, 128], strides = [1, 1]} : vector<8x384xf32> to vector<8x128xf32>
    %117 = vector.extract_strided_slice %114 {offsets = [0, 256], sizes = [8, 128], strides = [1, 1]} : vector<8x384xf32> to vector<8x128xf32>
    %118 = vector.extract_strided_slice %108 {offsets = [0, 384], sizes = [8, 128], strides = [1, 1]} : vector<8x512xf32> to vector<8x128xf32>
    %119 = math.tanh %118 : vector<8x128xf32>
    %120 = arith.mulf %116, %103 : vector<8x128xf32>
    %121 = arith.mulf %115, %119 : vector<8x128xf32>
    %122 = arith.addf %120, %121 : vector<8x128xf32>
    %123 = math.tanh %122 : vector<8x128xf32>
    %124 = arith.mulf %117, %123 : vector<8x128xf32>
    %125 = vector.extract_strided_slice %7 {offsets = [48, 0], sizes = [8, 512], strides = [1, 1]} : vector<64x512xf32> to vector<8x512xf32>
    %cst_23 = arith.constant dense<0.000000e+00> : vector<8x512xf32>
    %126 = tpu.matmul %124, %8, %cst_23 {dimension_numbers = #tpu.dot_dimension_numbers<[1], [0], [0], [1], [0, 0, 1, 1], [], []>} : vector<8x128xf32>, vector<128x512xf32>, vector<8x512xf32> -> vector<8x512xf32>
    %127 = arith.addf %125, %126 : vector<8x512xf32>
    %128 = vector.extract_strided_slice %127 {offsets = [0, 0], sizes = [8, 384], strides = [1, 1]} : vector<8x512xf32> to vector<8x384xf32>
    %129 = arith.negf %128 : vector<8x384xf32>
    %130 = math.exp %129 : vector<8x384xf32>
    %cst_24 = arith.constant 1.000000e+00 : f32
    %131 = vector.broadcast %cst_24 : f32 to vector<8x384xf32>
    %132 = arith.addf %131, %130 : vector<8x384xf32>
    %133 = arith.divf %131, %132 : vector<8x384xf32>
    %134 = vector.extract_strided_slice %133 {offsets = [0, 0], sizes = [8, 128], strides = [1, 1]} : vector<8x384xf32> to vector<8x128xf32>
    %135 = vector.extract_strided_slice %133 {offsets = [0, 128], sizes = [8, 128], strides = [1, 1]} : vector<8x384xf32> to vector<8x128xf32>
    %136 = vector.extract_strided_slice %133 {offsets = [0, 256], sizes = [8, 128], strides = [1, 1]} : vector<8x384xf32> to vector<8x128xf32>
    %137 = vector.extract_strided_slice %127 {offsets = [0, 384], sizes = [8, 128], strides = [1, 1]} : vector<8x512xf32> to vector<8x128xf32>
    %138 = math.tanh %137 : vector<8x128xf32>
    %139 = arith.mulf %135, %122 : vector<8x128xf32>
    %140 = arith.mulf %134, %138 : vector<8x128xf32>
    %141 = arith.addf %139, %140 : vector<8x128xf32>
    %142 = math.tanh %141 : vector<8x128xf32>
    %143 = arith.mulf %136, %142 : vector<8x128xf32>
    %144 = vector.extract_strided_slice %7 {offsets = [56, 0], sizes = [8, 512], strides = [1, 1]} : vector<64x512xf32> to vector<8x512xf32>
    %cst_25 = arith.constant dense<0.000000e+00> : vector<8x512xf32>
    %145 = tpu.matmul %143, %8, %cst_25 {dimension_numbers = #tpu.dot_dimension_numbers<[1], [0], [0], [1], [0, 0, 1, 1], [], []>} : vector<8x128xf32>, vector<128x512xf32>, vector<8x512xf32> -> vector<8x512xf32>
    %146 = arith.addf %144, %145 : vector<8x512xf32>
    %147 = vector.extract_strided_slice %146 {offsets = [0, 0], sizes = [8, 384], strides = [1, 1]} : vector<8x512xf32> to vector<8x384xf32>
    %148 = arith.negf %147 : vector<8x384xf32>
    %149 = math.exp %148 : vector<8x384xf32>
    %cst_26 = arith.constant 1.000000e+00 : f32
    %150 = vector.broadcast %cst_26 : f32 to vector<8x384xf32>
    %151 = arith.addf %150, %149 : vector<8x384xf32>
    %152 = arith.divf %150, %151 : vector<8x384xf32>
    %153 = vector.extract_strided_slice %152 {offsets = [0, 0], sizes = [8, 128], strides = [1, 1]} : vector<8x384xf32> to vector<8x128xf32>
    %154 = vector.extract_strided_slice %152 {offsets = [0, 128], sizes = [8, 128], strides = [1, 1]} : vector<8x384xf32> to vector<8x128xf32>
    %155 = vector.extract_strided_slice %152 {offsets = [0, 256], sizes = [8, 128], strides = [1, 1]} : vector<8x384xf32> to vector<8x128xf32>
    %156 = vector.extract_strided_slice %146 {offsets = [0, 384], sizes = [8, 128], strides = [1, 1]} : vector<8x512xf32> to vector<8x128xf32>
    %157 = math.tanh %156 : vector<8x128xf32>
    %158 = arith.mulf %154, %141 : vector<8x128xf32>
    %159 = arith.mulf %153, %157 : vector<8x128xf32>
    %160 = arith.addf %158, %159 : vector<8x128xf32>
    %161 = math.tanh %160 : vector<8x128xf32>
    %162 = arith.mulf %155, %161 : vector<8x128xf32>
    %163 = vector.broadcast %1 : vector<1x128xf32> to vector<8x128xf32>
    %164 = arith.mulf %162, %163 : vector<8x128xf32>
    %cst_27 = arith.constant dense<0.000000e+00> : vector<8xf32>
    %165 = vector.multi_reduction <add>, %164, %cst_27 [1] : vector<8x128xf32> to vector<8xf32>
    %166 = vector.shape_cast %165 : vector<8xf32> to vector<8x1xf32>
    %167 = vector.broadcast %2 : vector<1x1xf32> to vector<8x1xf32>
    %168 = arith.addf %166, %167 : vector<8x1xf32>
    %c0_28 = arith.constant 0 : index
    %c0_29 = arith.constant 0 : index
    %169 = vector.load %arg5[%c0_28, %c0_29] : memref<8x1xf32, #tpu.memory_space<vmem>>, vector<8x1xf32>
    tpu.vector_store %arg5[%c0_28, %c0_29], %168 {strides = array<i32>} : memref<8x1xf32, #tpu.memory_space<vmem>>, vector<8x1xf32>,
    return
  }
  func.func @transform_0(%arg0: i32) -> (i32, i32) {
    %c0_i32 = arith.constant 0 : i32
    %c0_i32_0 = arith.constant 0 : i32
    %c0_i32_1 = arith.constant 0 : i32
    return %c0_i32, %c0_i32_0 : i32, i32
  }
  func.func @transform_1(%arg0: i32) -> (i32, i32) {
    %c0_i32 = arith.constant 0 : i32
    %c0_i32_0 = arith.constant 0 : i32
    %c0_i32_1 = arith.constant 0 : i32
    return %c0_i32, %c0_i32_0 : i32, i32
  }
  func.func @transform_2(%arg0: i32) -> (i32, i32) {
    %c0_i32 = arith.constant 0 : i32
    %c0_i32_0 = arith.constant 0 : i32
    %c0_i32_1 = arith.constant 0 : i32
    return %c0_i32, %c0_i32_0 : i32, i32
  }
  func.func @transform_3(%arg0: i32) -> (i32, i32) {
    %c0_i32 = arith.constant 0 : i32
    %c0_i32_0 = arith.constant 0 : i32
    %c0_i32_1 = arith.constant 0 : i32
    return %c0_i32, %c0_i32_0 : i32, i32
  }
  func.func @transform_4(%arg0: i32) -> (i32, i32) {
    %c0_i32 = arith.constant 0 : i32
    %c0_i32_0 = arith.constant 0 : i32
    %c0_i32_1 = arith.constant 0 : i32
    return %c0_i32, %c0_i32_0 : i32, i32
  }
}

</mosaic_0001>

<bundles_post_ra>
// kernel: tpu_custom_call.1
= control target key start
LH: loop header
LB: loop body
LE: loop exit
PB: predicated region body
PF: predicated region fallthrough
CT: control target
= control target key end

     0   :  { %9 = vsyncpa [#allocation3], 0  ;;  %s2021_s15 = smov [#allocation2]   ;;  %s3059_s0 = inlined_call_operand.vmem [shape: f32[64,8], index: 0, kind: input, shape index: {}]   ;;  %s3060_s1 = inlined_call_operand.vmem [shape: f32[8,512], index: 1, kind: input, shape index: {}]   ;;  %s3061_s2 = inlined_call_operand.hbm [shape: f32[128,512], index: 2, kind: input, shape index: {}]   ;;  %s3062_s3 = inlined_call_operand.vmem [shape: f32[2,512], index: 3, kind: input, shape index: {}]   ;;  %s3063_s4 = inlined_call_operand.vmem [shape: f32[8,1], index: 4, kind: output, shape index: {}]  }
   0x1   :  { %s19_s16 = sshll.u32 %s2021_s15, 4  ;;  %s20_s16 = int_to_ptr.vmem [resolvable:$true] %s19_s16 }
   0x2   :  { %s2007_s17 = scalar_lea.vmem %s20_s16, 8192  ;;  %p2012_p1 = scmp.lt.s32.totalorder %s20_s16, %s20_s16 }
   0x3   :  { %p2008_p0 = scmp.ne.s32.totalorder %s20_s16, %s2007_s17  ;;  %p2013_p2 = scmp.lt.s32.totalorder %s2007_s17, %s2007_s17 }
   0x5   :  { %p2014_p3 = por %p2013_p2, %p2012_p1 }
   0x7   :  { %p2015_p4 = pnand %p2014_p3, %p2008_p0 }
   0x9   :  { %2018 = shalt.err (!%p2015_p4)
}
   0xa   :  { %s2022_s18 = smov 512   ;;  %s2023_s19 = smov 32  }
   0xb   :  { %25 = dma.hbm_to_vmem [thread:$0]  %s3061_s2, 8192, %s20_s16, [#allocation3], %s2022_s18, %s2022_s18, %s2023_s19  }
   0xc   :  { %2019 = dma.done.wait [#allocation3], 8192  }
   0xd   :  { %2020 = vsyncadd [#allocation3], 4294959104  ;;  %v3064_v0 = vmov 0.0   ;;  %v43_v1 = vld [vmem:[%s3060_s1 + $0x8] sm:$0xff]  ;;  %v45_v2 = vld [vmem:[%s3060_s1 + $0x18] sm:$0xff]  ;;  %vm67_vm0 = vcmask 64512  }
   0xe   :  { %156 = vmatprep.mubr.f32.mxu0 %v3064_v0  ;;  %269 = vmatprep.mubr.f32.mxu1 %v3064_v0  ;;  %v42_v3 = vld [vmem:[%s3060_s1] sm:$0xff]  ;;  %v44_v4 = vld [vmem:[%s3060_s1 + $0x10] sm:$0xff]  ;;  %v2070_v6 = vld [vmem:[#allocation2 + $0x1e8] sm:$0xff]  ;;  %vm1754_vm1 = vcmask 7168  }
   0xf   :  { %122 = vmatprep.subr.mxu0 %v43_v1  ;;  %235 = vmatprep.subr.mxu1 %v45_v2  ;;  %v34_v5 = vld [vmem:[%s3059_s0] sm:$0xff]  ;;  %3152 = vst [vmem:[#allocation5_spill] sm:$0xff] %v2070_v6  ;;  %v2072_v7 = vld [vmem:[#allocation2 + $0x1f8] sm:$0xff]  ;;  %v2076_v9 = vld [vmem:[#allocation2 + $0x1f0] sm:$0xff] }
  0x10   :  { %123 = vmatpush1.msra.mxu0 %v42_v3  ;;  %236 = vmatpush1.msra.mxu1 %v44_v4  ;;  %3153 = vst [vmem:[#allocation6_spill] sm:$0xff] %v2072_v7  ;;  %v2074_v8 = vld [vmem:[#allocation2 + $0x1e0] sm:$0xff]  ;;  %v2080_v10 = vld [vmem:[#allocation2 + $0x1c8] sm:$0xff]  ;;  %v2082_v11 = vld [vmem:[#allocation2 + $0x1d8] sm:$0xff] }
  0x11   :  { %1761 = vmatmul.mubr.msk.f32.vlgmr.msra.gmra.mxu0 %vm67_vm0, %v34_v5  ;;  %1769 = vmatmul.mubr.msk.f32.vlgmr.msra.gmra.mxu1 %vm67_vm0, %v34_v5  ;;  %v2088_v12 = vld [vmem:[#allocation2 + $0x1c0] sm:$0xff]  ;;  %v2090_v13 = vld [vmem:[#allocation2 + $0x1d0] sm:$0xff]  ;;  %v35_v14 = vld [vmem:[%s3059_s0 + $0x8] sm:$0xff] }
  0x12   :  { %382 = vmatprep.subr.mxu0 %v2070_v6  ;;  %453 = vmatprep.subr.mxu1 %v2072_v7  ;;  %v2099_v15 = vld [vmem:[#allocation2 + $0x1a8] sm:$0xff]  ;;  %v2101_v16 = vld [vmem:[#allocation2 + $0x1b8] sm:$0xff]  ;;  %v2105_v17 = vld [vmem:[#allocation2 + $0x1a0] sm:$0xff] }
  0x13   :  { %383 = vmatpush1.msra.mxu0 %v2074_v8  ;;  %454 = vmatpush1.msra.mxu1 %v2076_v9  ;;  %v2107_v18 = vld [vmem:[#allocation2 + $0x1b0] sm:$0xff]  ;;  %v2111_v19 = vld [vmem:[#allocation2 + $0x188] sm:$0xff]  ;;  %v2113_v20 = vld [vmem:[#allocation2 + $0x198] sm:$0xff] }
  0x14   :  { %384 = vmatprep.subr.mxu0 %v2080_v10  ;;  %455 = vmatprep.subr.mxu1 %v2082_v11  ;;  %v2119_v21 = vld [vmem:[#allocation2 + $0x180] sm:$0xff]  ;;  %v2121_v22 = vld [vmem:[#allocation2 + $0x190] sm:$0xff]  ;;  %v2130_v24 = vld [vmem:[#allocation2 + $0x168] sm:$0xff] }
  0x15   :  { %162 = vmatprep.mubr.f32.mxu0 %v3064_v0  ;;  %275 = vmatprep.mubr.f32.mxu1 %v3064_v0  ;;  %v36_v23 = vld [vmem:[%s3059_s0 + $0x10] sm:$0xff]  ;;  %v2132_v25 = vld [vmem:[#allocation2 + $0x178] sm:$0xff]  ;;  %v2136_v26 = vld [vmem:[#allocation2 + $0x160] sm:$0xff] }
  0x16   :  { %385 = vmatpush1.msra.mxu0 %v2088_v12  ;;  %456 = vmatpush1.msra.mxu1 %v2090_v13  ;;  %v2138_v27 = vld [vmem:[#allocation2 + $0x170] sm:$0xff]  ;;  %v2142_v28 = vld [vmem:[#allocation2 + $0x148] sm:$0xff]  ;;  %v2144_v29 = vld [vmem:[#allocation2 + $0x158] sm:$0xff] }
  0x17   :  { %1762 = vmatmul.mubr.msk.f32.gmra.mxu0 %vm67_vm0, %v35_v14  ;;  %1770 = vmatmul.mubr.msk.f32.gmra.mxu1 %vm67_vm0, %v35_v14  ;;  %v2150_v30 = vld [vmem:[#allocation2 + $0x140] sm:$0xff]  ;;  %v2152_v31 = vld [vmem:[#allocation2 + $0x150] sm:$0xff]  ;;  %v37_v32 = vld [vmem:[%s3059_s0 + $0x18] sm:$0xff] }
  0x18   :  { %386 = vmatprep.subr.mxu0 %v2099_v15  ;;  %457 = vmatprep.subr.mxu1 %v2101_v16  ;;  %v2161_v33 = vld [vmem:[#allocation2 + $0x128] sm:$0xff]  ;;  %v2163_v34 = vld [vmem:[#allocation2 + $0x138] sm:$0xff]  ;;  %v2167_v35 = vld [vmem:[#allocation2 + $0x120] sm:$0xff] }
  0x19   :  { %387 = vmatpush1.msra.mxu0 %v2105_v17  ;;  %458 = vmatpush1.msra.mxu1 %v2107_v18  ;;  %v2169_v36 = vld [vmem:[#allocation2 + $0x130] sm:$0xff]  ;;  %v2173_v37 = vld [vmem:[#allocation2 + $0x108] sm:$0xff]  ;;  %v2175_v38 = vld [vmem:[#allocation2 + $0x118] sm:$0xff] }
  0x1a   :  { %388 = vmatprep.subr.mxu0 %v2111_v19  ;;  %459 = vmatprep.subr.mxu1 %v2113_v20  ;;  %v2181_v39 = vld [vmem:[#allocation2 + $0x100] sm:$0xff]  ;;  %v2183_v40 = vld [vmem:[#allocation2 + $0x110] sm:$0xff]  ;;  %v2192_v42 = vld [vmem:[#allocation2 + $0xe8] sm:$0xff] }
  0x1b   :  { %168 = vmatprep.mubr.f32.mxu0 %v3064_v0  ;;  %281 = vmatprep.mubr.f32.mxu1 %v3064_v0  ;;  %v38_v41 = vld [vmem:[%s3059_s0 + $0x20] sm:$0xff]  ;;  %v2194_v43 = vld [vmem:[#allocation2 + $0xf8] sm:$0xff]  ;;  %v2200_v45 = vld [vmem:[#allocation2 + $0xf0] sm:$0xff] }
  0x1c   :  { %389 = vmatpush1.msra.mxu0 %v2119_v21  ;;  %460 = vmatpush1.msra.mxu1 %v2121_v22  ;;  %v2198_v44 = vld [vmem:[#allocation2 + $0xe0] sm:$0xff]  ;;  %v2204_v46 = vld [vmem:[#allocation2 + $0xc8] sm:$0xff]  ;;  %v2206_v47 = vld [vmem:[#allocation2 + $0xd8] sm:$0xff] }
  0x1d   :  { %1763 = vmatmul.mubr.msk.f32.gmra.mxu0 %vm67_vm0, %v36_v23  ;;  %1771 = vmatmul.mubr.msk.f32.gmra.mxu1 %vm67_vm0, %v36_v23  ;;  %v2212_v48 = vld [vmem:[#allocation2 + $0xc0] sm:$0xff]  ;;  %v2214_v49 = vld [vmem:[#allocation2 + $0xd0] sm:$0xff]  ;;  %v39_v50 = vld [vmem:[%s3059_s0 + $0x28] sm:$0xff] }
  0x1e   :  { %390 = vmatprep.subr.mxu0 %v2130_v24  ;;  %461 = vmatprep.subr.mxu1 %v2132_v25  ;;  %v2223_v51 = vld [vmem:[#allocation2 + $0xa8] sm:$0xff]  ;;  %v2225_v52 = vld [vmem:[#allocation2 + $0xb8] sm:$0xff]  ;;  %v2229_v53 = vld [vmem:[#allocation2 + $0xa0] sm:$0xff] }
  0x1f   :  { %391 = vmatpush1.msra.mxu0 %v2136_v26  ;;  %462 = vmatpush1.msra.mxu1 %v2138_v27  ;;  %v2231_v54 = vld [vmem:[#allocation2 + $0xb0] sm:$0xff]  ;;  %v2235_v55 = vld [vmem:[#allocation2 + $0x88] sm:$0xff]  ;;  %v2237_v56 = vld [vmem:[#allocation2 + $0x98] sm:$0xff] }
  0x20   :  { %392 = vmatprep.subr.mxu0 %v2142_v28  ;;  %463 = vmatprep.subr.mxu1 %v2144_v29  ;;  %3154 = vst [vmem:[#allocation7_spill] sm:$0xff] %v2235_v55  ;;  %3155 = vst [vmem:[#allocation8_spill] sm:$0xff] %v2237_v56  ;;  %v2243_v57 = vld [vmem:[#allocation2 + $0x80] sm:$0xff]  ;;  %v2245_v58 = vld [vmem:[#allocation2 + $0x90] sm:$0xff] }
  0x21   :  { %174 = vmatprep.mubr.f32.mxu0 %v3064_v0  ;;  %287 = vmatprep.mubr.f32.mxu1 %v3064_v0  ;;  %3156 = vst [vmem:[#allocation9_spill] sm:$0xff] %v2243_v57  ;;  %3157 = vst [vmem:[#allocation10_spill] sm:$0xff] %v2245_v58  ;;  %v40_v59 = vld [vmem:[%s3059_s0 + $0x30] sm:$0xff]  ;;  %v2254_v60 = vld [vmem:[#allocation2 + $0x68] sm:$0xff] }
  0x22   :  { %393 = vmatpush1.msra.mxu0 %v2150_v30  ;;  %464 = vmatpush1.msra.mxu1 %v2152_v31  ;;  %3158 = vst [vmem:[#allocation11_spill] sm:$0xff] %v2254_v60  ;;  %v2256_v61 = vld [vmem:[#allocation2 + $0x78] sm:$0xff]  ;;  %v2260_v62 = vld [vmem:[#allocation2 + $0x60] sm:$0xff]  ;;  %v2262_v63 = vld [vmem:[#allocation2 + $0x70] sm:$0xff] }
  0x23   :  { %1764 = vmatmul.mubr.msk.f32.gmra.mxu0 %vm67_vm0, %v37_v32  ;;  %1772 = vmatmul.mubr.msk.f32.gmra.mxu1 %vm67_vm0, %v37_v32  ;;  %3159 = vst [vmem:[#allocation12_spill] sm:$0xff] %v2256_v61  ;;  %3160 = vst [vmem:[#allocation13_spill] sm:$0xff] %v2260_v62  ;;  %v2266_v1 = vld [vmem:[#allocation2 + $0x48] sm:$0xff]  ;;  %v2268_v2 = vld [vmem:[#allocation2 + $0x58] sm:$0xff] }
  0x24   :  { %394 = vmatprep.subr.mxu0 %v2161_v33  ;;  %465 = vmatprep.subr.mxu1 %v2163_v34  ;;  %3161 = vst [vmem:[#allocation14_spill] sm:$0xff] %v2262_v63  ;;  %3162 = vst [vmem:[#allocation15_spill] sm:$0xff] %v2266_v1  ;;  %v2274_v3 = vld [vmem:[#allocation2 + $0x40] sm:$0xff]  ;;  %v2276_v4 = vld [vmem:[#allocation2 + $0x50] sm:$0xff] }
  0x25   :  { %395 = vmatpush1.msra.mxu0 %v2167_v35  ;;  %466 = vmatpush1.msra.mxu1 %v2169_v36  ;;  %3163 = vst [vmem:[#allocation16_spill] sm:$0xff] %v2268_v2  ;;  %3164 = vst [vmem:[#allocation17_spill] sm:$0xff] %v2274_v3  ;;  %v41_v5 = vld [vmem:[%s3059_s0 + $0x38] sm:$0xff]  ;;  %v2285_v14 = vld [vmem:[#allocation2 + $0x28] sm:$0xff] }
  0x26   :  { %396 = vmatprep.subr.mxu0 %v2173_v37  ;;  %467 = vmatprep.subr.mxu1 %v2175_v38  ;;  %3165 = vst [vmem:[#allocation18_spill] sm:$0xff] %v2276_v4  ;;  %3166 = vst [vmem:[#allocation19_spill] sm:$0xff] %v2285_v14  ;;  %v2287_v23 = vld [vmem:[#allocation2 + $0x38] sm:$0xff]  ;;  %v2291_v32 = vld [vmem:[#allocation2 + $0x20] sm:$0xff] }
  0x27   :  { %180 = vmatprep.mubr.f32.mxu0 %v3064_v0  ;;  %293 = vmatprep.mubr.f32.mxu1 %v3064_v0  ;;  %3167 = vst [vmem:[#allocation20_spill] sm:$0xff] %v2287_v23  ;;  %3168 = vst [vmem:[#allocation21_spill] sm:$0xff] %v2291_v32 }
  0x28   :  { %397 = vmatpush1.msra.mxu0 %v2181_v39  ;;  %468 = vmatpush1.msra.mxu1 %v2183_v40 }
  0x29   :  { %1765 = vmatmul.mubr.msk.f32.gmra.mxu0 %vm67_vm0, %v38_v41  ;;  %1773 = vmatmul.mubr.msk.f32.gmra.mxu1 %vm67_vm0, %v38_v41  ;;  %v2293_v41 = vld [vmem:[#allocation2 + $0x30] sm:$0xff] }
  0x2a   :  { %398 = vmatprep.subr.mxu0 %v2192_v42  ;;  %469 = vmatprep.subr.mxu1 %v2194_v43  ;;  %3169 = vst [vmem:[#allocation22_spill] sm:$0xff] %v2293_v41 }
  0x2b   :  { %399 = vmatpush1.msra.mxu0 %v2198_v44  ;;  %470 = vmatpush1.msra.mxu1 %v2200_v45 }
  0x2c   :  { %400 = vmatprep.subr.mxu0 %v2204_v46  ;;  %471 = vmatprep.subr.mxu1 %v2206_v47 }
  0x2d   :  { %186 = vmatprep.mubr.f32.mxu0 %v3064_v0  ;;  %299 = vmatprep.mubr.f32.mxu1 %v3064_v0 }
  0x2e   :  { %401 = vmatpush1.msra.mxu0 %v2212_v48  ;;  %472 = vmatpush1.msra.mxu1 %v2214_v49 }
  0x2f   :  { %1766 = vmatmul.mubr.msk.f32.gmra.mxu0 %vm67_vm0, %v39_v50  ;;  %1774 = vmatmul.mubr.msk.f32.gmra.mxu1 %vm67_vm0, %v39_v50  ;;  %v2297_v50 = vld [vmem:[#allocation2 + $0x8] sm:$0xff] }
  0x30   :  { %402 = vmatprep.subr.mxu0 %v2223_v51  ;;  %473 = vmatprep.subr.mxu1 %v2225_v52  ;;  %3170 = vst [vmem:[#allocation23_spill] sm:$0xff] %v2297_v50 }
  0x31   :  { %403 = vmatpush1.msra.mxu0 %v2229_v53  ;;  %474 = vmatpush1.msra.mxu1 %v2231_v54 }
  0x32   :  { %404 = vmatprep.subr.mxu0 %v2235_v55  ;;  %475 = vmatprep.subr.mxu1 %v2237_v56 }
  0x33   :  { %192 = vmatprep.mubr.f32.mxu0 %v3064_v0  ;;  %305 = vmatprep.mubr.f32.mxu1 %v3064_v0 }
  0x34   :  { %405 = vmatpush1.msra.mxu0 %v2243_v57  ;;  %476 = vmatpush1.msra.mxu1 %v2245_v58 }
  0x35   :  { %1767 = vmatmul.mubr.msk.f32.gmra.mxu0 %vm67_vm0, %v40_v59  ;;  %1775 = vmatmul.mubr.msk.f32.gmra.mxu1 %vm67_vm0, %v40_v59  ;;  %v2299_v59 = vld [vmem:[#allocation2 + $0x18] sm:$0xff] }
  0x36   :  { %406 = vmatprep.subr.mxu0 %v2254_v60  ;;  %477 = vmatprep.subr.mxu1 %v2256_v61  ;;  %3171 = vst [vmem:[#allocation24_spill] sm:$0xff] %v2299_v59 }
  0x37   :  { %407 = vmatpush1.msra.mxu0 %v2260_v62  ;;  %478 = vmatpush1.msra.mxu1 %v2262_v63 }
  0x38   :  { %408 = vmatprep.subr.mxu0 %v2266_v1  ;;  %479 = vmatprep.subr.mxu1 %v2268_v2 }
  0x39   :  { %198 = vmatprep.mubr.f32.mxu0 %v3064_v0  ;;  %311 = vmatprep.mubr.f32.mxu1 %v3064_v0  ;;  %v2303_v0 = vld [vmem:[#allocation2] sm:$0xff] }
  0x3a   :  { %409 = vmatpush1.msra.mxu0 %v2274_v3  ;;  %480 = vmatpush1.msra.mxu1 %v2276_v4  ;;  %3172 = vst [vmem:[#allocation25_spill] sm:$0xff] %v2303_v0  ;;  %v2307_v4 = vld [vmem:[#allocation2 + $0x10] sm:$0xff] }
  0x3b   :  { %1768 = vmatmul.mubr.msk.f32.gmra.mxu0 %vm67_vm0, %v41_v5  ;;  %1776 = vmatmul.mubr.msk.f32.gmra.mxu1 %vm67_vm0, %v41_v5  ;;  %3173 = vst [vmem:[#allocation26_spill] sm:$0xff] %v2307_v4  ;;  %v3174_v5 = vmov 0.0  }
  0x3c   :  { %410 = vmatprep.subr.mxu0 %v2285_v14  ;;  %481 = vmatprep.subr.mxu1 %v2287_v23 }
  0x3d   :  { %411 = vmatpush1.msra.mxu0 %v2291_v32  ;;  %482 = vmatpush1.msra.mxu1 %v2293_v41 }
  0x3e   :  { %412 = vmatprep.subr.mxu0 %v2297_v50  ;;  %483 = vmatprep.subr.mxu1 %v2299_v59 }
  0x3f   :  { %413 = vmatpush1.msra.mxu0 %v2303_v0  ;;  %446 = vmatprep.mubr.f32.mxu0 %v3174_v5 }
  0x40   :  { %484 = vmatpush1.msra.mxu1 %v2307_v4  ;;  %517 = vmatprep.mubr.f32.mxu1 %v3174_v5 }
  0x41   :  { %447 = vmatmul.mubr.f32.vlgmr.msra.gmra.mxu0 %v3174_v5  ;;  %518 = vmatmul.mubr.f32.vlgmr.msra.gmra.mxu1 %v3174_v5 }
  0x42   :  { %552 = vmatprep.subr.mxu0 %v2070_v6  ;;  %623 = vmatprep.subr.mxu1 %v2072_v7 }
  0x43   :  { %553 = vmatpush1.msra.mxu0 %v2074_v8  ;;  %624 = vmatpush1.msra.mxu1 %v2076_v9 }
  0x44   :  { %554 = vmatprep.subr.mxu0 %v2080_v10  ;;  %625 = vmatprep.subr.mxu1 %v2082_v11 }
  0x45   :  { %555 = vmatpush1.msra.mxu0 %v2088_v12  ;;  %626 = vmatpush1.msra.mxu1 %v2090_v13 }
  0x46   :  { %556 = vmatprep.subr.mxu0 %v2099_v15  ;;  %627 = vmatprep.subr.mxu1 %v2101_v16 }
  0x47   :  { %557 = vmatpush1.msra.mxu0 %v2105_v17  ;;  %628 = vmatpush1.msra.mxu1 %v2107_v18 }
  0x48   :  { %558 = vmatprep.subr.mxu0 %v2111_v19  ;;  %629 = vmatprep.subr.mxu1 %v2113_v20 }
  0x49   :  { %559 = vmatpush1.msra.mxu0 %v2119_v21  ;;  %630 = vmatpush1.msra.mxu1 %v2121_v22 }
  0x4a   :  { %560 = vmatprep.subr.mxu0 %v2130_v24  ;;  %631 = vmatprep.subr.mxu1 %v2132_v25 }
  0x4b   :  { %561 = vmatpush1.msra.mxu0 %v2136_v26  ;;  %632 = vmatpush1.msra.mxu1 %v2138_v27 }
  0x4c   :  { %562 = vmatprep.subr.mxu0 %v2142_v28  ;;  %633 = vmatprep.subr.mxu1 %v2144_v29 }
  0x4d   :  { %563 = vmatpush1.msra.mxu0 %v2150_v30  ;;  %634 = vmatpush1.msra.mxu1 %v2152_v31 }
  0x4e   :  { %564 = vmatprep.subr.mxu0 %v2161_v33  ;;  %635 = vmatprep.subr.mxu1 %v2163_v34 }
  0x4f   :  { %565 = vmatpush1.msra.mxu0 %v2167_v35  ;;  %636 = vmatpush1.msra.mxu1 %v2169_v36 }
  0x50   :  { %566 = vmatprep.subr.mxu0 %v2173_v37  ;;  %637 = vmatprep.subr.mxu1 %v2175_v38 }
  0x51   :  { %567 = vmatpush1.msra.mxu0 %v2181_v39  ;;  %638 = vmatpush1.msra.mxu1 %v2183_v40 }
  0x52   :  { %568 = vmatprep.subr.mxu0 %v2192_v42  ;;  %639 = vmatprep.subr.mxu1 %v2194_v43 }
  0x53   :  { %569 = vmatpush1.msra.mxu0 %v2198_v44  ;;  %640 = vmatpush1.msra.mxu1 %v2200_v45 }
  0x54   :  { %570 = vmatprep.subr.mxu0 %v2204_v46  ;;  %641 = vmatprep.subr.mxu1 %v2206_v47 }
  0x55   :  { %571 = vmatpush1.msra.mxu0 %v2212_v48  ;;  %642 = vmatpush1.msra.mxu1 %v2214_v49 }
  0x56   :  { %572 = vmatprep.subr.mxu0 %v2223_v51  ;;  %643 = vmatprep.subr.mxu1 %v2225_v52 }
  0x57   :  { %573 = vmatpush1.msra.mxu0 %v2229_v53  ;;  %644 = vmatpush1.msra.mxu1 %v2231_v54 }
  0x58   :  { %574 = vmatprep.subr.mxu0 %v2235_v55  ;;  %645 = vmatprep.subr.mxu1 %v2237_v56  ;;  %v3175_v55 = vld [vmem:[#allocation18_spill] sm:$0xff] }
  0x59   :  { %575 = vmatpush1.msra.mxu0 %v2243_v57  ;;  %646 = vmatpush1.msra.mxu1 %v2245_v58 }
  0x5a   :  { %576 = vmatprep.subr.mxu0 %v2254_v60  ;;  %647 = vmatprep.subr.mxu1 %v2256_v61 }
  0x5b   :  { %577 = vmatpush1.msra.mxu0 %v2260_v62  ;;  %648 = vmatpush1.msra.mxu1 %v2262_v63 }
  0x5c   :  { %578 = vmatprep.subr.mxu0 %v2266_v1  ;;  %649 = vmatprep.subr.mxu1 %v2268_v2 }
  0x5d   :  { %579 = vmatpush1.msra.mxu0 %v2274_v3  ;;  %650 = vmatpush1.msra.mxu1 %v3175_v55 }
  0x5e   :  { %580 = vmatprep.subr.mxu0 %v2285_v14  ;;  %651 = vmatprep.subr.mxu1 %v2287_v23  ;;  %v47_v23 = vlaneseq }
  0x5f   :  { %581 = vmatpush1.msra.mxu0 %v2291_v32  ;;  %652 = vmatpush1.msra.mxu1 %v2293_v41 }
  0x60   :  { %582 = vmatprep.subr.mxu0 %v2297_v50  ;;  %653 = vmatprep.subr.mxu1 %v2299_v59  ;;  %v48_v32 = vshrl.u32 %v47_v23, 7 }
  0x61   :  { %583 = vmatpush1.msra.mxu0 %v2303_v0  ;;  %616 = vmatprep.mubr.f32.mxu0 %v3174_v5  ;;  %v31_v0 = vld [vmem:[%s3062_s3] ss:$2 sm:$0xf] }
  0x62   :  { %654 = vmatpush1.msra.mxu1 %v2307_v4  ;;  %687 = vmatprep.mubr.f32.mxu1 %v3174_v5  ;;  %v49_v50 = vsub.s32 0, %v48_v32  ;;  %v57_v59 = vsub.s32 2, %v48_v32  ;;  %v53_v5 = vsub.s32 1, %v48_v32 }
  0x63   :  { %722 = vmatprep.subr.mxu0 %v2070_v6  ;;  %793 = vmatprep.subr.mxu1 %v2072_v7  ;;  %v61_v6 = vsub.s32 3, %v48_v32 }
  0x64   :  { %v50_v3 = vrot.slane %v31_v0, %v49_v50  ;;  %v2396_v7 = vrot.slane %v31_v0, %v57_v59  ;;  %v54_v1 = vrot.slane %v31_v0, %v53_v5 }
  0x65   :  { %v2398_v63 = vrot.slane %v31_v0, %v61_v6 }
  0xd1   :  { %v2385_v14 = vpop.f32.mrf.mxu0  ;;  %v2387_v41 = vpop.f32.mrf.mxu1 }
  0xd3   :  { %v2392_v55 = vpop.f32.mrf.mxu0  ;;  %v2394_v4 = vpop.f32.mrf.mxu1 }
  0xd7   :  { %v164_v23 = vpop.f32.mrf.mxu0  ;;  %v277_v2 = vpop.f32.mrf.mxu1 }
  0xd8   :  { %v2400_v62 = vadd.f32 %v164_v23, %v50_v3  ;;  %v2403_v61 = vadd.f32 %v277_v2, %v2396_v7 }
  0xd9   :  { %v166_v60 = vpop.f32.mrf.mxu0  ;;  %v279_v58 = vpop.f32.mrf.mxu1 }
  0xda   :  { %3176 = vst [vmem:[#allocation27_spill] sm:$0xff] %v2400_v62  ;;  %3177 = vst [vmem:[#allocation28_spill] sm:$0xff] %v2403_v61  ;;  %v2405_v57 = vadd.f32 %v166_v60, %v54_v1  ;;  %v2408_v56 = vadd.f32 %v279_v58, %v2398_v63 }
  0xdc   :  { %3178 = vst [vmem:[#allocation29_spill] sm:$0xff] %v2405_v57  ;;  %3179 = vst [vmem:[#allocation30_spill] sm:$0xff] %v2408_v56 }
  0xdd   :  { %v170_v32 = vpop.f32.mrf.mxu0  ;;  %v283_v50 = vpop.f32.mrf.mxu1 }
  0xde   :  { %v2410_v59 = vadd.f32 %v170_v32, %v50_v3  ;;  %v2413_v5 = vadd.f32 %v283_v50, %v2396_v7 }
  0xdf   :  { %v172_v0 = vpop.f32.mrf.mxu0  ;;  %v285_v6 = vpop.f32.mrf.mxu1 }
  0xe0   :  { %3180 = vst [vmem:[#allocation31_spill] sm:$0xff] %v2410_v59  ;;  %3181 = vst [vmem:[#allocation32_spill] sm:$0xff] %v2413_v5  ;;  %v2415_v23 = vadd.f32 %v172_v0, %v54_v1  ;;  %v2418_v2 = vadd.f32 %v285_v6, %v2398_v63 }
  0xe2   :  { %3182 = vst [vmem:[#allocation33_spill] sm:$0xff] %v2415_v23  ;;  %3183 = vst [vmem:[#allocation34_spill] sm:$0xff] %v2418_v2 }
  0xe3   :  { %v176_v61 = vpop.f32.mrf.mxu0  ;;  %v289_v60 = vpop.f32.mrf.mxu1 }
  0xe4   :  { %v2420_v57 = vadd.f32 %v176_v61, %v50_v3  ;;  %v2423_v58 = vadd.f32 %v289_v60, %v2396_v7 }
  0xe5   :  { %v178_v56 = vpop.f32.mrf.mxu0  ;;  %v291_v32 = vpop.f32.mrf.mxu1 }
  0xe6   :  { %3184 = vst [vmem:[#allocation35_spill] sm:$0xff] %v2420_v57  ;;  %3185 = vst [vmem:[#allocation36_spill] sm:$0xff] %v2423_v58  ;;  %v2425_v59 = vadd.f32 %v178_v56, %v54_v1  ;;  %v2428_v50 = vadd.f32 %v291_v32, %v2398_v63 }
  0xe8   :  { %3186 = vst [vmem:[#allocation37_spill] sm:$0xff] %v2425_v59  ;;  %3187 = vst [vmem:[#allocation38_spill] sm:$0xff] %v2428_v50 }
  0xe9   :  { %v182_v5 = vpop.f32.mrf.mxu0  ;;  %v295_v0 = vpop.f32.mrf.mxu1 }
  0xea   :  { %v2430_v23 = vadd.f32 %v182_v5, %v50_v3  ;;  %v2433_v6 = vadd.f32 %v295_v0, %v2396_v7 }
  0xeb   :  { %v184_v2 = vpop.f32.mrf.mxu0  ;;  %v297_v61 = vpop.f32.mrf.mxu1 }
  0xec   :  { %3188 = vst [vmem:[#allocation39_spill] sm:$0xff] %v2430_v23  ;;  %3189 = vst [vmem:[#allocation40_spill] sm:$0xff] %v2433_v6  ;;  %v2435_v57 = vadd.f32 %v184_v2, %v54_v1  ;;  %v2438_v60 = vadd.f32 %v297_v61, %v2398_v63 }
  0xee   :  { %3190 = vst [vmem:[#allocation41_spill] sm:$0xff] %v2435_v57  ;;  %3191 = vst [vmem:[#allocation42_spill] sm:$0xff] %v2438_v60 }
  0xef   :  { %v188_v58 = vpop.f32.mrf.mxu0  ;;  %v301_v56 = vpop.f32.mrf.mxu1 }
  0xf0   :  { %v2440_v59 = vadd.f32 %v188_v58, %v50_v3  ;;  %v2443_v32 = vadd.f32 %v301_v56, %v2396_v7 }
  0xf1   :  { %v190_v50 = vpop.f32.mrf.mxu0  ;;  %v303_v5 = vpop.f32.mrf.mxu1 }
  0xf2   :  { %3192 = vst [vmem:[#allocation43_spill] sm:$0xff] %v2440_v59  ;;  %3193 = vst [vmem:[#allocation44_spill] sm:$0xff] %v2443_v32  ;;  %v2445_v23 = vadd.f32 %v190_v50, %v54_v1  ;;  %v2448_v0 = vadd.f32 %v303_v5, %v2398_v63 }
  0xf4   :  { %3194 = vst [vmem:[#allocation45_spill] sm:$0xff] %v2445_v23  ;;  %3195 = vst [vmem:[#allocation46_spill] sm:$0xff] %v2448_v0 }
  0xf5   :  { %v194_v6 = vpop.f32.mrf.mxu0  ;;  %v307_v2 = vpop.f32.mrf.mxu1 }
  0xf6   :  { %v2450_v57 = vadd.f32 %v194_v6, %v50_v3  ;;  %v2453_v61 = vadd.f32 %v307_v2, %v2396_v7 }
  0xf7   :  { %v196_v60 = vpop.f32.mrf.mxu0  ;;  %v309_v58 = vpop.f32.mrf.mxu1 }
  0xf8   :  { %3196 = vst [vmem:[#allocation47_spill] sm:$0xff] %v2450_v57  ;;  %3197 = vst [vmem:[#allocation48_spill] sm:$0xff] %v2453_v61  ;;  %v2455_v59 = vadd.f32 %v196_v60, %v54_v1  ;;  %v2458_v56 = vadd.f32 %v309_v58, %v2398_v63  ;;  %v159_v60 = vadd.f32 %v2385_v14, %v50_v3 }
  0xf9   :  { %v161_v58 = vadd.f32 %v2392_v55, %v54_v1 }
  0xfa   :  { %3198 = vst [vmem:[#allocation49_spill] sm:$0xff] %v2455_v59  ;;  %3199 = vst [vmem:[#allocation50_spill] sm:$0xff] %v2458_v56 }
  0xfb   :  { %v200_v32 = vpop.f32.mrf.mxu0  ;;  %v313_v50 = vpop.f32.mrf.mxu1 }
  0xfc   :  { %v2460_v23 = vadd.f32 %v200_v32, %v50_v3  ;;  %v2463_v5 = vadd.f32 %v313_v50, %v2396_v7 }
  0xfd   :  { %v202_v0 = vpop.f32.mrf.mxu0  ;;  %v315_v6 = vpop.f32.mrf.mxu1 }
  0xfe   :  { %3200 = vst [vmem:[#allocation51_spill] sm:$0xff] %v2460_v23  ;;  %3201 = vst [vmem:[#allocation52_spill] sm:$0xff] %v2463_v5  ;;  %v2465_v57 = vadd.f32 %v202_v0, %v54_v1  ;;  %v2468_v2 = vadd.f32 %v315_v6, %v2398_v63  ;;  %v272_v0 = vadd.f32 %v2387_v41, %v2396_v7 }
  0xff   :  { %v274_v6 = vadd.f32 %v2394_v4, %v2398_v63 }
 0x100   :  { %3202 = vst [vmem:[#allocation53_spill] sm:$0xff] %v2465_v57  ;;  %3203 = vst [vmem:[#allocation54_spill] sm:$0xff] %v2468_v2 }
 0x101   :  { %v448_v61 = vpop.f32.mrf.mxu0  ;;  %v519_v50 = vpop.f32.mrf.mxu1 }
 0x102   :  { %v524_v56 = vadd.f32 %v448_v61, %v159_v60  ;;  %v526_v5 = vadd.f32 %v519_v50, %v272_v0  ;;  %v3207_v50 = vld [vmem:[#allocation10_spill] sm:$0xff]  ;;  %v3208_v0 = vld [vmem:[#allocation11_spill] sm:$0xff] }
 0x103   :  { %v450_v59 = vpop.f32.mrf.mxu0  ;;  %v521_v57 = vpop.f32.mrf.mxu1 }
 0x104   :  { %v1777_v62 = vmul.f32 -1.442695, %v524_v56  ;;  %v525_v32 = vadd.f32 %v450_v59, %v161_v58  ;;  %v1779_v3 = vmul.f32 -1.442695, %v526_v5  ;;  %v527_v2 = vadd.f32 %v521_v57, %v274_v6  ;;  %v3204_v5 = vld [vmem:[#allocation7_spill] sm:$0xff]  ;;  %v3209_v6 = vld [vmem:[#allocation12_spill] sm:$0xff] }
 0x106   :  { %1807 = vpow2.f32 %v1777_v62  ;;  %v1778_v23 = vmul.f32 -1.442695, %v525_v32  ;;  %v3206_v32 = vld [vmem:[#allocation9_spill] sm:$0xff] }
 0x108   :  { %1809 = vpow2.f32 %v1778_v23 }
 0x109   :  { %1811 = vpow2.f32 %v1779_v3  ;;  %v3210_v3 = vld [vmem:[#allocation13_spill] sm:$0xff] }
 0x113   :  { %v1808_v14 = vpop.eup %1807 }
 0x114   :  { %v537_v55 = vadd.f32 1.0, %v1808_v14  ;;  %v3211_v14 = vld [vmem:[#allocation14_spill] sm:$0xff] }
 0x115   :  { %v1810_v1 = vpop.eup %1809 }
 0x116   :  { %1813 = vrcp.f32 %v537_v55  ;;  %v538_v59 = vadd.f32 1.0, %v1810_v1  ;;  %v1812_v62 = vpop.eup %1811  ;;  %v3212_v55 = vld [vmem:[#allocation15_spill] sm:$0xff]  ;;  %v3213_v1 = vld [vmem:[#allocation16_spill] sm:$0xff] }
 0x117   :  { %1815 = vtanh.f32 %v527_v2  ;;  %v539_v7 = vadd.f32 1.0, %v1812_v62  ;;  %v3205_v2 = vld [vmem:[#allocation8_spill] sm:$0xff]  ;;  %v3215_v62 = vld [vmem:[#allocation18_spill] sm:$0xff] }
 0x118   :  { %1817 = vrcp.f32 %v538_v59  ;;  %v3214_v59 = vld [vmem:[#allocation17_spill] sm:$0xff] }
 0x119   :  { %1819 = vrcp.f32 %v539_v7  ;;  %v3219_v7 = vld [vmem:[#allocation22_spill] sm:$0xff] }
 0x123   :  { %v1814_v23 = vpop.eup %1813 }
 0x124   :  { %v1816_v61 = vpop.eup %1815 }
 0x125   :  { %v1818_v56 = vpop.eup %1817  ;;  %v548_v60 = vmul.f32 %v1816_v61, %v1814_v23  ;;  %v3216_v23 = vld [vmem:[#allocation19_spill] sm:$0xff]  ;;  %v3217_v61 = vld [vmem:[#allocation20_spill] sm:$0xff] }
 0x126   :  { %v547_v41 = vmul.f32 0.0, %v1818_v56  ;;  %v1820_v57 = vpop.eup %1819  ;;  %v3218_v56 = vld [vmem:[#allocation21_spill] sm:$0xff] }
 0x128   :  { %v2476_v58 = vadd.f32 %v548_v60, %v547_v41  ;;  %v3220_v41 = vld [vmem:[#allocation23_spill] sm:$0xff]  ;;  %v3221_v60 = vld [vmem:[#allocation24_spill] sm:$0xff] }
 0x12a   :  { %1821 = vtanh.f32 %v2476_v58 }
 0x137   :  { %v1822_v63 = vpop.eup %1821 }
 0x138   :  { %v551_v4 = vmul.f32 %v1822_v63, %v1820_v57  ;;  %v3222_v57 = vld [vmem:[#allocation25_spill] sm:$0xff]  ;;  %v3223_v63 = vmov 0.0  }
 0x13a   :  { %617 = vmatmul.mubr.f32.vlgmr.msra.gmra.mxu0 %v551_v4  ;;  %688 = vmatmul.mubr.f32.vlgmr.msra.gmra.mxu1 %v551_v4  ;;  %v3224_v4 = vld [vmem:[#allocation26_spill] sm:$0xff] }
 0x13b   :  { %723 = vmatpush1.msra.mxu0 %v2074_v8  ;;  %794 = vmatpush1.msra.mxu1 %v2076_v9 }
 0x13c   :  { %724 = vmatprep.subr.mxu0 %v2080_v10  ;;  %795 = vmatprep.subr.mxu1 %v2082_v11 }
 0x13d   :  { %725 = vmatpush1.msra.mxu0 %v2088_v12  ;;  %796 = vmatpush1.msra.mxu1 %v2090_v13 }
 0x13e   :  { %726 = vmatprep.subr.mxu0 %v2099_v15  ;;  %797 = vmatprep.subr.mxu1 %v2101_v16 }
 0x13f   :  { %727 = vmatpush1.msra.mxu0 %v2105_v17  ;;  %798 = vmatpush1.msra.mxu1 %v2107_v18 }
 0x140   :  { %728 = vmatprep.subr.mxu0 %v2111_v19  ;;  %799 = vmatprep.subr.mxu1 %v2113_v20 }
 0x141   :  { %729 = vmatpush1.msra.mxu0 %v2119_v21  ;;  %800 = vmatpush1.msra.mxu1 %v2121_v22 }
 0x142   :  { %730 = vmatprep.subr.mxu0 %v2130_v24  ;;  %801 = vmatprep.subr.mxu1 %v2132_v25 }
 0x143   :  { %731 = vmatpush1.msra.mxu0 %v2136_v26  ;;  %802 = vmatpush1.msra.mxu1 %v2138_v27 }
 0x144   :  { %732 = vmatprep.subr.mxu0 %v2142_v28  ;;  %803 = vmatprep.subr.mxu1 %v2144_v29 }
 0x145   :  { %733 = vmatpush1.msra.mxu0 %v2150_v30  ;;  %804 = vmatpush1.msra.mxu1 %v2152_v31 }
 0x146   :  { %734 = vmatprep.subr.mxu0 %v2161_v33  ;;  %805 = vmatprep.subr.mxu1 %v2163_v34 }
 0x147   :  { %735 = vmatpush1.msra.mxu0 %v2167_v35  ;;  %806 = vmatpush1.msra.mxu1 %v2169_v36 }
 0x148   :  { %736 = vmatprep.subr.mxu0 %v2173_v37  ;;  %807 = vmatprep.subr.mxu1 %v2175_v38 }
 0x149   :  { %737 = vmatpush1.msra.mxu0 %v2181_v39  ;;  %808 = vmatpush1.msra.mxu1 %v2183_v40 }
 0x14a   :  { %738 = vmatprep.subr.mxu0 %v2192_v42  ;;  %809 = vmatprep.subr.mxu1 %v2194_v43 }
 0x14b   :  { %739 = vmatpush1.msra.mxu0 %v2198_v44  ;;  %810 = vmatpush1.msra.mxu1 %v2200_v45 }
 0x14c   :  { %740 = vmatprep.subr.mxu0 %v2204_v46  ;;  %811 = vmatprep.subr.mxu1 %v2206_v47 }
 0x14d   :  { %741 = vmatpush1.msra.mxu0 %v2212_v48  ;;  %812 = vmatpush1.msra.mxu1 %v2214_v49 }
 0x14e   :  { %742 = vmatprep.subr.mxu0 %v2223_v51  ;;  %813 = vmatprep.subr.mxu1 %v2225_v52 }
 0x14f   :  { %743 = vmatpush1.msra.mxu0 %v2229_v53  ;;  %814 = vmatpush1.msra.mxu1 %v2231_v54 }
 0x150   :  { %744 = vmatprep.subr.mxu0 %v3204_v5  ;;  %815 = vmatprep.subr.mxu1 %v3205_v2 }
 0x151   :  { %745 = vmatpush1.msra.mxu0 %v3206_v32  ;;  %816 = vmatpush1.msra.mxu1 %v3207_v50 }
 0x152   :  { %746 = vmatprep.subr.mxu0 %v3208_v0  ;;  %817 = vmatprep.subr.mxu1 %v3209_v6 }
 0x153   :  { %747 = vmatpush1.msra.mxu0 %v3210_v3  ;;  %818 = vmatpush1.msra.mxu1 %v3211_v14  ;;  %v3229_v14 = vld [vmem:[#allocation28_spill] sm:$0xff] }
 0x154   :  { %748 = vmatprep.subr.mxu0 %v3212_v55  ;;  %819 = vmatprep.subr.mxu1 %v3213_v1 }
 0x155   :  { %749 = vmatpush1.msra.mxu0 %v3214_v59  ;;  %820 = vmatpush1.msra.mxu1 %v3215_v62  ;;  %v3225_v62 = vld [vmem:[#allocation5_spill] sm:$0xff] }
 0x156   :  { %750 = vmatprep.subr.mxu0 %v3216_v23  ;;  %821 = vmatprep.subr.mxu1 %v3217_v61  ;;  %v3226_v23 = vld [vmem:[#allocation6_spill] sm:$0xff] }
 0x157   :  { %751 = vmatpush1.msra.mxu0 %v3218_v56  ;;  %822 = vmatpush1.msra.mxu1 %v3219_v7  ;;  %v3227_v56 = vld [vmem:[#allocation27_spill] sm:$0xff] }
 0x158   :  { %752 = vmatprep.subr.mxu0 %v3220_v41  ;;  %823 = vmatprep.subr.mxu1 %v3221_v60  ;;  %v3228_v41 = vld [vmem:[#allocation29_spill] sm:$0xff] }
 0x159   :  { %753 = vmatpush1.msra.mxu0 %v3222_v57  ;;  %786 = vmatprep.mubr.f32.mxu0 %v3223_v63 }
 0x15a   :  { %824 = vmatpush1.msra.mxu1 %v3224_v4  ;;  %857 = vmatprep.mubr.f32.mxu1 %v3223_v63  ;;  %v3230_v63 = vld [vmem:[#allocation30_spill] sm:$0xff] }
 0x15b   :  { %892 = vmatprep.subr.mxu0 %v3225_v62  ;;  %963 = vmatprep.subr.mxu1 %v3226_v23 }
 0x1fa   :  { %v618_v61 = vpop.f32.mrf.mxu0  ;;  %v689_v57 = vpop.f32.mrf.mxu1 }
 0x1fb   :  { %v694_v59 = vadd.f32 %v618_v61, %v3227_v56  ;;  %v696_v3 = vadd.f32 %v689_v57, %v3229_v14 }
 0x1fc   :  { %v620_v7 = vpop.f32.mrf.mxu0  ;;  %v691_v4 = vpop.f32.mrf.mxu1 }
 0x1fd   :  { %v1780_v1 = vmul.f32 -1.442695, %v694_v59  ;;  %v695_v55 = vadd.f32 %v620_v7, %v3228_v41  ;;  %v1782_v6 = vmul.f32 -1.442695, %v696_v3  ;;  %v697_v0 = vadd.f32 %v691_v4, %v3230_v63 }
 0x1ff   :  { %1823 = vpow2.f32 %v1780_v1  ;;  %v1781_v60 = vmul.f32 -1.442695, %v695_v55 }
 0x201   :  { %1825 = vpow2.f32 %v1781_v60 }
 0x202   :  { %1827 = vpow2.f32 %v1782_v6 }
 0x203   :  { %1829 = vtanh.f32 %v697_v0 }
 0x20c   :  { %v1824_v62 = vpop.eup %1823 }
 0x20d   :  { %v707_v50 = vadd.f32 1.0, %v1824_v62  ;;  %v3253_v62 = vld [vmem:[#allocation32_spill] sm:$0xff] }
 0x20e   :  { %v1826_v23 = vpop.eup %1825 }
 0x20f   :  { %1831 = vrcp.f32 %v707_v50  ;;  %v708_v61 = vadd.f32 1.0, %v1826_v23  ;;  %v1828_v59 = vpop.eup %1827  ;;  %v3252_v50 = vld [vmem:[#allocation33_spill] sm:$0xff] }
 0x210   :  { %v1830_v56 = vpop.eup %1829  ;;  %v709_v41 = vadd.f32 1.0, %v1828_v59 }
 0x211   :  { %1833 = vrcp.f32 %v708_v61 }
 0x212   :  { %1835 = vrcp.f32 %v709_v41 }
 0x21c   :  { %v1832_v1 = vpop.eup %1831 }
 0x21d   :  { %v718_v55 = vmul.f32 %v1832_v1, %v1830_v56  ;;  %v3254_v56 = vld [vmem:[#allocation34_spill] sm:$0xff] }
 0x21e   :  { %v1834_v7 = vpop.eup %1833 }
 0x21f   :  { %v717_v14 = vmul.f32 %v1834_v7, %v2476_v58  ;;  %v1836_v3 = vpop.eup %1835 }
 0x221   :  { %v2550_v60 = vadd.f32 %v718_v55, %v717_v14 }
 0x223   :  { %1837 = vtanh.f32 %v2550_v60 }
 0x230   :  { %v1838_v6 = vpop.eup %1837 }
 0x231   :  { %v721_v57 = vmul.f32 %v1838_v6, %v1836_v3 }
 0x233   :  { %787 = vmatmul.mubr.f32.vlgmr.msra.gmra.mxu0 %v721_v57  ;;  %858 = vmatmul.mubr.f32.vlgmr.msra.gmra.mxu1 %v721_v57 }
 0x234   :  { %893 = vmatpush1.msra.mxu0 %v2074_v8  ;;  %964 = vmatpush1.msra.mxu1 %v2076_v9  ;;  %v3231_v8 = vld [vmem:[#allocation10_spill] sm:$0xff]  ;;  %v3232_v9 = vld [vmem:[#allocation11_spill] sm:$0xff] }
 0x235   :  { %894 = vmatprep.subr.mxu0 %v2080_v10  ;;  %965 = vmatprep.subr.mxu1 %v2082_v11  ;;  %v3233_v10 = vld [vmem:[#allocation12_spill] sm:$0xff]  ;;  %v3234_v11 = vld [vmem:[#allocation13_spill] sm:$0xff] }
 0x236   :  { %895 = vmatpush1.msra.mxu0 %v2088_v12  ;;  %966 = vmatpush1.msra.mxu1 %v2090_v13  ;;  %v3235_v12 = vld [vmem:[#allocation14_spill] sm:$0xff]  ;;  %v3236_v13 = vld [vmem:[#allocation15_spill] sm:$0xff] }
 0x237   :  { %896 = vmatprep.subr.mxu0 %v2099_v15  ;;  %967 = vmatprep.subr.mxu1 %v2101_v16  ;;  %v3237_v15 = vld [vmem:[#allocation16_spill] sm:$0xff]  ;;  %v3238_v16 = vld [vmem:[#allocation17_spill] sm:$0xff] }
 0x238   :  { %897 = vmatpush1.msra.mxu0 %v2105_v17  ;;  %968 = vmatpush1.msra.mxu1 %v2107_v18  ;;  %v3239_v17 = vld [vmem:[#allocation18_spill] sm:$0xff]  ;;  %v3240_v18 = vld [vmem:[#allocation19_spill] sm:$0xff] }
 0x239   :  { %898 = vmatprep.subr.mxu0 %v2111_v19  ;;  %969 = vmatprep.subr.mxu1 %v2113_v20  ;;  %v3241_v19 = vld [vmem:[#allocation20_spill] sm:$0xff]  ;;  %v3242_v20 = vld [vmem:[#allocation21_spill] sm:$0xff] }
 0x23a   :  { %899 = vmatpush1.msra.mxu0 %v2119_v21  ;;  %970 = vmatpush1.msra.mxu1 %v2121_v22  ;;  %v3243_v21 = vld [vmem:[#allocation22_spill] sm:$0xff]  ;;  %v3244_v22 = vld [vmem:[#allocation23_spill] sm:$0xff] }
 0x23b   :  { %900 = vmatprep.subr.mxu0 %v2130_v24  ;;  %971 = vmatprep.subr.mxu1 %v2132_v25  ;;  %v3245_v24 = vld [vmem:[#allocation24_spill] sm:$0xff]  ;;  %v3246_v25 = vld [vmem:[#allocation25_spill] sm:$0xff] }
 0x23c   :  { %901 = vmatpush1.msra.mxu0 %v2136_v26  ;;  %972 = vmatpush1.msra.mxu1 %v2138_v27  ;;  %v3247_v26 = vmov 0.0   ;;  %v3248_v27 = vld [vmem:[#allocation26_spill] sm:$0xff] }
 0x23d   :  { %902 = vmatprep.subr.mxu0 %v2142_v28  ;;  %973 = vmatprep.subr.mxu1 %v2144_v29  ;;  %v2617_v28 = vld [vmem:[#allocation2 + $0x1e8] sm:$0xff]  ;;  %v2620_v29 = vld [vmem:[#allocation2 + $0x1f8] sm:$0xff] }
 0x23e   :  { %903 = vmatpush1.msra.mxu0 %v2150_v30  ;;  %974 = vmatpush1.msra.mxu1 %v2152_v31  ;;  %3249 = vst [vmem:[#allocation7_spill] sm:$0xff] %v2617_v28  ;;  %3250 = vst [vmem:[#allocation8_spill] sm:$0xff] %v2620_v29  ;;  %v3251_v31 = vld [vmem:[#allocation31_spill] sm:$0xff] }
 0x23f   :  { %904 = vmatprep.subr.mxu0 %v2161_v33  ;;  %975 = vmatprep.subr.mxu1 %v2163_v34 }
 0x240   :  { %905 = vmatpush1.msra.mxu0 %v2167_v35  ;;  %976 = vmatpush1.msra.mxu1 %v2169_v36 }
 0x241   :  { %906 = vmatprep.subr.mxu0 %v2173_v37  ;;  %977 = vmatprep.subr.mxu1 %v2175_v38 }
 0x242   :  { %907 = vmatpush1.msra.mxu0 %v2181_v39  ;;  %978 = vmatpush1.msra.mxu1 %v2183_v40 }
 0x243   :  { %908 = vmatprep.subr.mxu0 %v2192_v42  ;;  %979 = vmatprep.subr.mxu1 %v2194_v43 }
 0x244   :  { %909 = vmatpush1.msra.mxu0 %v2198_v44  ;;  %980 = vmatpush1.msra.mxu1 %v2200_v45 }
 0x245   :  { %910 = vmatprep.subr.mxu0 %v2204_v46  ;;  %981 = vmatprep.subr.mxu1 %v2206_v47 }
 0x246   :  { %911 = vmatpush1.msra.mxu0 %v2212_v48  ;;  %982 = vmatpush1.msra.mxu1 %v2214_v49 }
 0x247   :  { %912 = vmatprep.subr.mxu0 %v2223_v51  ;;  %983 = vmatprep.subr.mxu1 %v2225_v52 }
 0x248   :  { %913 = vmatpush1.msra.mxu0 %v2229_v53  ;;  %984 = vmatpush1.msra.mxu1 %v2231_v54 }
 0x249   :  { %914 = vmatprep.subr.mxu0 %v3204_v5  ;;  %985 = vmatprep.subr.mxu1 %v3205_v2 }
 0x24a   :  { %915 = vmatpush1.msra.mxu0 %v3206_v32  ;;  %986 = vmatpush1.msra.mxu1 %v3231_v8 }
 0x24b   :  { %916 = vmatprep.subr.mxu0 %v3232_v9  ;;  %987 = vmatprep.subr.mxu1 %v3233_v10 }
 0x24c   :  { %917 = vmatpush1.msra.mxu0 %v3234_v11  ;;  %988 = vmatpush1.msra.mxu1 %v3235_v12 }
 0x24d   :  { %918 = vmatprep.subr.mxu0 %v3236_v13  ;;  %989 = vmatprep.subr.mxu1 %v3237_v15 }
 0x24e   :  { %919 = vmatpush1.msra.mxu0 %v3238_v16  ;;  %990 = vmatpush1.msra.mxu1 %v3239_v17 }
 0x24f   :  { %920 = vmatprep.subr.mxu0 %v3240_v18  ;;  %991 = vmatprep.subr.mxu1 %v3241_v19 }
 0x250   :  { %921 = vmatpush1.msra.mxu0 %v3242_v20  ;;  %992 = vmatpush1.msra.mxu1 %v3243_v21 }
 0x251   :  { %922 = vmatprep.subr.mxu0 %v3244_v22  ;;  %993 = vmatprep.subr.mxu1 %v3245_v24 }
 0x252   :  { %923 = vmatpush1.msra.mxu0 %v3246_v25  ;;  %956 = vmatprep.mubr.f32.mxu0 %v3247_v26 }
 0x253   :  { %994 = vmatpush1.msra.mxu1 %v3248_v27  ;;  %1027 = vmatprep.mubr.f32.mxu1 %v3247_v26 }
 0x254   :  { %1062 = vmatprep.subr.mxu0 %v2617_v28  ;;  %1133 = vmatprep.subr.mxu1 %v2620_v29 }
 0x2f3   :  { %v788_v30 = vpop.f32.mrf.mxu0  ;;  %v859_v4 = vpop.f32.mrf.mxu1 }
 0x2f4   :  { %v864_v33 = vadd.f32 %v788_v30, %v3251_v31  ;;  %v866_v23 = vadd.f32 %v859_v4, %v3253_v62  ;;  %v2631_v4 = vld [vmem:[#allocation2 + $0x1e0] sm:$0xff]  ;;  %v2634_v62 = vld [vmem:[#allocation2 + $0x1f0] sm:$0xff] }
 0x2f5   :  { %v790_v34 = vpop.f32.mrf.mxu0  ;;  %v861_v61 = vpop.f32.mrf.mxu1 }
 0x2f6   :  { %v1783_v58 = vmul.f32 -1.442695, %v864_v33  ;;  %v865_v0 = vadd.f32 %v790_v34, %v3252_v50  ;;  %v1785_v59 = vmul.f32 -1.442695, %v866_v23  ;;  %v867_v1 = vadd.f32 %v861_v61, %v3254_v56  ;;  %v2637_v23 = vld [vmem:[#allocation2 + $0x1c8] sm:$0xff]  ;;  %v2643_v61 = vld [vmem:[#allocation2 + $0x1c0] sm:$0xff] }
 0x2f7   :  { %v2649_v56 = vld [vmem:[#allocation2 + $0x1a8] sm:$0xff] }
 0x2f8   :  { %1839 = vpow2.f32 %v1783_v58  ;;  %v1784_v63 = vmul.f32 -1.442695, %v865_v0 }
 0x2fa   :  { %1841 = vpow2.f32 %v1784_v63 }
 0x2fb   :  { %1843 = vpow2.f32 %v1785_v59  ;;  %v2646_v59 = vld [vmem:[#allocation2 + $0x1d0] sm:$0xff] }
 0x2fc   :  { %1845 = vtanh.f32 %v867_v1  ;;  %v2652_v1 = vld [vmem:[#allocation2 + $0x1b8] sm:$0xff] }
 0x305   :  { %v1840_v55 = vpop.eup %1839 }
 0x306   :  { %v877_v7 = vadd.f32 1.0, %v1840_v55  ;;  %v2655_v55 = vld [vmem:[#allocation2 + $0x1a0] sm:$0xff] }
 0x307   :  { %v1842_v41 = vpop.eup %1841 }
 0x308   :  { %1847 = vrcp.f32 %v877_v7  ;;  %v878_v14 = vadd.f32 1.0, %v1842_v41  ;;  %v1844_v3 = vpop.eup %1843  ;;  %v2658_v7 = vld [vmem:[#allocation2 + $0x1b0] sm:$0xff]  ;;  %v2661_v41 = vld [vmem:[#allocation2 + $0x188] sm:$0xff] }
 0x309   :  { %v1846_v6 = vpop.eup %1845  ;;  %v879_v33 = vadd.f32 1.0, %v1844_v3  ;;  %v2667_v3 = vld [vmem:[#allocation2 + $0x180] sm:$0xff] }
 0x30a   :  { %1849 = vrcp.f32 %v878_v14  ;;  %v2664_v14 = vld [vmem:[#allocation2 + $0x198] sm:$0xff] }
 0x30b   :  { %1851 = vrcp.f32 %v879_v33  ;;  %v2682_v33 = vld [vmem:[#allocation2 + $0x170] sm:$0xff] }
 0x30c   :  { %3256 = vst [vmem:[#allocation5_spill] sm:$0xff] %v2682_v33 }
 0x315   :  { %v1848_v57 = vpop.eup %1847 }
 0x316   :  { %v888_v30 = vmul.f32 %v1848_v57, %v1846_v6  ;;  %v2670_v6 = vld [vmem:[#allocation2 + $0x190] sm:$0xff]  ;;  %v2673_v57 = vld [vmem:[#allocation2 + $0x168] sm:$0xff] }
 0x317   :  { %v1850_v31 = vpop.eup %1849 }
 0x318   :  { %v887_v34 = vmul.f32 %v1850_v31, %v2550_v60  ;;  %v1852_v50 = vpop.eup %1851  ;;  %v2640_v60 = vld [vmem:[#allocation2 + $0x1d8] sm:$0xff]  ;;  %v2679_v31 = vld [vmem:[#allocation2 + $0x160] sm:$0xff] }
 0x319   :  { %3255 = vst [vmem:[#allocation9_spill] sm:$0xff] %v2679_v31 }
 0x31a   :  { %v2628_v58 = vadd.f32 %v888_v30, %v887_v34  ;;  %v2676_v30 = vld [vmem:[#allocation2 + $0x178] sm:$0xff]  ;;  %v2685_v34 = vld [vmem:[#allocation2 + $0x148] sm:$0xff] }
 0x31c   :  { %1853 = vtanh.f32 %v2628_v58 }
 0x329   :  { %v1854_v0 = vpop.eup %1853 }
 0x32a   :  { %v891_v63 = vmul.f32 %v1854_v0, %v1852_v50  ;;  %v2688_v50 = vld [vmem:[#allocation2 + $0x158] sm:$0xff]  ;;  %v2691_v0 = vld [vmem:[#allocation2 + $0x140] sm:$0xff] }
 0x32c   :  { %957 = vmatmul.mubr.f32.vlgmr.msra.gmra.mxu0 %v891_v63  ;;  %1028 = vmatmul.mubr.f32.vlgmr.msra.gmra.mxu1 %v891_v63  ;;  %v2694_v63 = vld [vmem:[#allocation2 + $0x150] sm:$0xff] }
 0x32d   :  { %1063 = vmatpush1.msra.mxu0 %v2631_v4  ;;  %1134 = vmatpush1.msra.mxu1 %v2634_v62 }
 0x32e   :  { %1064 = vmatprep.subr.mxu0 %v2637_v23  ;;  %1135 = vmatprep.subr.mxu1 %v2640_v60 }
 0x32f   :  { %1065 = vmatpush1.msra.mxu0 %v2643_v61  ;;  %1136 = vmatpush1.msra.mxu1 %v2646_v59 }
 0x330   :  { %1066 = vmatprep.subr.mxu0 %v2649_v56  ;;  %1137 = vmatprep.subr.mxu1 %v2652_v1 }
 0x331   :  { %1067 = vmatpush1.msra.mxu0 %v2655_v55  ;;  %1138 = vmatpush1.msra.mxu1 %v2658_v7 }
 0x332   :  { %1068 = vmatprep.subr.mxu0 %v2661_v41  ;;  %1139 = vmatprep.subr.mxu1 %v2664_v14 }
 0x333   :  { %1069 = vmatpush1.msra.mxu0 %v2667_v3  ;;  %1140 = vmatpush1.msra.mxu1 %v2670_v6 }
 0x334   :  { %1070 = vmatprep.subr.mxu0 %v2673_v57  ;;  %1141 = vmatprep.subr.mxu1 %v2676_v30 }
 0x335   :  { %1071 = vmatpush1.msra.mxu0 %v2679_v31  ;;  %1142 = vmatpush1.msra.mxu1 %v2682_v33  ;;  %v2697_v31 = vld [vmem:[#allocation2 + $0x128] sm:$0xff]  ;;  %v2700_v33 = vld [vmem:[#allocation2 + $0x138] sm:$0xff] }
 0x336   :  { %1072 = vmatprep.subr.mxu0 %v2685_v34  ;;  %1143 = vmatprep.subr.mxu1 %v2688_v50 }
 0x337   :  { %1073 = vmatpush1.msra.mxu0 %v2691_v0  ;;  %1144 = vmatpush1.msra.mxu1 %v2694_v63 }
 0x338   :  { %1074 = vmatprep.subr.mxu0 %v2697_v31  ;;  %1145 = vmatprep.subr.mxu1 %v2700_v33 }
 0x339   :  { %1075 = vmatpush1.msra.mxu0 %v2167_v35  ;;  %1146 = vmatpush1.msra.mxu1 %v2169_v36  ;;  %v3257_v36 = vld [vmem:[#allocation35_spill] sm:$0xff] }
 0x33a   :  { %1076 = vmatprep.subr.mxu0 %v2173_v37  ;;  %1147 = vmatprep.subr.mxu1 %v2175_v38 }
 0x33b   :  { %1077 = vmatpush1.msra.mxu0 %v2181_v39  ;;  %1148 = vmatpush1.msra.mxu1 %v2183_v40  ;;  %v3258_v40 = vld [vmem:[#allocation37_spill] sm:$0xff] }
 0x33c   :  { %1078 = vmatprep.subr.mxu0 %v2192_v42  ;;  %1149 = vmatprep.subr.mxu1 %v2194_v43 }
 0x33d   :  { %1079 = vmatpush1.msra.mxu0 %v2198_v44  ;;  %1150 = vmatpush1.msra.mxu1 %v2200_v45  ;;  %v3259_v45 = vld [vmem:[#allocation36_spill] sm:$0xff] }
 0x33e   :  { %1080 = vmatprep.subr.mxu0 %v2204_v46  ;;  %1151 = vmatprep.subr.mxu1 %v2206_v47 }
 0x33f   :  { %1081 = vmatpush1.msra.mxu0 %v2212_v48  ;;  %1152 = vmatpush1.msra.mxu1 %v2214_v49  ;;  %v3260_v49 = vld [vmem:[#allocation38_spill] sm:$0xff] }
 0x340   :  { %1082 = vmatprep.subr.mxu0 %v2223_v51  ;;  %1153 = vmatprep.subr.mxu1 %v2225_v52 }
 0x341   :  { %1083 = vmatpush1.msra.mxu0 %v2229_v53  ;;  %1154 = vmatpush1.msra.mxu1 %v2231_v54 }
 0x342   :  { %1084 = vmatprep.subr.mxu0 %v3204_v5  ;;  %1155 = vmatprep.subr.mxu1 %v3205_v2 }
 0x343   :  { %1085 = vmatpush1.msra.mxu0 %v3206_v32  ;;  %1156 = vmatpush1.msra.mxu1 %v3231_v8 }
 0x344   :  { %1086 = vmatprep.subr.mxu0 %v3232_v9  ;;  %1157 = vmatprep.subr.mxu1 %v3233_v10 }
 0x345   :  { %1087 = vmatpush1.msra.mxu0 %v3234_v11  ;;  %1158 = vmatpush1.msra.mxu1 %v3235_v12 }
 0x346   :  { %1088 = vmatprep.subr.mxu0 %v3236_v13  ;;  %1159 = vmatprep.subr.mxu1 %v3237_v15 }
 0x347   :  { %1089 = vmatpush1.msra.mxu0 %v3238_v16  ;;  %1160 = vmatpush1.msra.mxu1 %v3239_v17 }
 0x348   :  { %1090 = vmatprep.subr.mxu0 %v3240_v18  ;;  %1161 = vmatprep.subr.mxu1 %v3241_v19  ;;  %v3261_v18 = vld [vmem:[#allocation9_spill] sm:$0xff] }
 0x349   :  { %1091 = vmatpush1.msra.mxu0 %v3242_v20  ;;  %1162 = vmatpush1.msra.mxu1 %v3243_v21  ;;  %v3262_v19 = vld [vmem:[#allocation5_spill] sm:$0xff]  ;;  %v2780_v21 = vld [vmem:[#allocation2 + $0x130] sm:$0xff] }
 0x34a   :  { %1092 = vmatprep.subr.mxu0 %v3244_v22  ;;  %1163 = vmatprep.subr.mxu1 %v3245_v24  ;;  %v2777_v20 = vld [vmem:[#allocation2 + $0x120] sm:$0xff]  ;;  %v2783_v22 = vld [vmem:[#allocation2 + $0x108] sm:$0xff]  ;;  %v2786_v24 = vld [vmem:[#allocation2 + $0x118] sm:$0xff] }
 0x34b   :  { %1093 = vmatpush1.msra.mxu0 %v3246_v25  ;;  %1126 = vmatprep.mubr.f32.mxu0 %v3247_v26  ;;  %v2789_v25 = vld [vmem:[#allocation2 + $0x100] sm:$0xff] }
 0x34c   :  { %1164 = vmatpush1.msra.mxu1 %v3248_v27  ;;  %1197 = vmatprep.mubr.f32.mxu1 %v3247_v26  ;;  %v2792_v27 = vld [vmem:[#allocation2 + $0x110] sm:$0xff] }
 0x34d   :  { %1232 = vmatprep.subr.mxu0 %v2617_v28  ;;  %1303 = vmatprep.subr.mxu1 %v2620_v29 }
 0x3ec   :  { %v958_v35 = vpop.f32.mrf.mxu0  ;;  %v1029_v44 = vpop.f32.mrf.mxu1 }
 0x3ed   :  { %v1034_v37 = vadd.f32 %v958_v35, %v3257_v36  ;;  %v1036_v46 = vadd.f32 %v1029_v44, %v3259_v45  ;;  %v2798_v35 = vld [vmem:[#allocation2 + $0xf8] sm:$0xff]  ;;  %v2801_v36 = vld [vmem:[#allocation2 + $0xe0] sm:$0xff] }
 0x3ee   :  { %v960_v38 = vpop.f32.mrf.mxu0  ;;  %v1031_v47 = vpop.f32.mrf.mxu1  ;;  %v2822_v44 = vld [vmem:[#allocation2 + $0xb8] sm:$0xff]  ;;  %v2825_v45 = vld [vmem:[#allocation2 + $0xa0] sm:$0xff] }
 0x3ef   :  { %v1786_v39 = vmul.f32 -1.442695, %v1034_v37  ;;  %v1035_v42 = vadd.f32 %v960_v38, %v3258_v40  ;;  %v1788_v48 = vmul.f32 -1.442695, %v1036_v46  ;;  %v1037_v51 = vadd.f32 %v1031_v47, %v3260_v49  ;;  %v2804_v37 = vld [vmem:[#allocation2 + $0xf0] sm:$0xff]  ;;  %v2807_v38 = vld [vmem:[#allocation2 + $0xc8] sm:$0xff] }
 0x3f0   :  { %v2813_v40 = vld [vmem:[#allocation2 + $0xc0] sm:$0xff]  ;;  %v2828_v46 = vld [vmem:[#allocation2 + $0xb0] sm:$0xff]  ;;  %v2831_v47 = vld [vmem:[#allocation2 + $0x88] sm:$0xff] }
 0x3f1   :  { %1855 = vpow2.f32 %v1786_v39  ;;  %v1787_v43 = vmul.f32 -1.442695, %v1035_v42  ;;  %v2810_v39 = vld [vmem:[#allocation2 + $0xd8] sm:$0xff]  ;;  %v2816_v42 = vld [vmem:[#allocation2 + $0xd0] sm:$0xff]  ;;  %v2837_v49 = vld [vmem:[#allocation2 + $0x80] sm:$0xff] }
 0x3f3   :  { %1857 = vpow2.f32 %v1787_v43  ;;  %v2819_v43 = vld [vmem:[#allocation2 + $0xa8] sm:$0xff] }
 0x3f4   :  { %1859 = vpow2.f32 %v1788_v48  ;;  %v2834_v48 = vld [vmem:[#allocation2 + $0x98] sm:$0xff] }
 0x3f5   :  { %1861 = vtanh.f32 %v1037_v51  ;;  %v2840_v51 = vld [vmem:[#allocation2 + $0x90] sm:$0xff] }
 0x3f6   :  { %3263 = vst [vmem:[#allocation6_spill] sm:$0xff] %v2840_v51 }
 0x3fe   :  { %v1856_v52 = vpop.eup %1855 }
 0x3ff   :  { %v1047_v53 = vadd.f32 1.0, %v1856_v52  ;;  %v2843_v52 = vld [vmem:[#allocation2 + $0x68] sm:$0xff] }
 0x400   :  { %v1858_v54 = vpop.eup %1857  ;;  %3264 = vst [vmem:[#allocation27_spill] sm:$0xff] %v2843_v52 }
 0x401   :  { %1863 = vrcp.f32 %v1047_v53  ;;  %v1048_v5 = vadd.f32 1.0, %v1858_v54  ;;  %v1860_v2 = vpop.eup %1859  ;;  %v2846_v53 = vld [vmem:[#allocation2 + $0x78] sm:$0xff]  ;;  %v2849_v54 = vld [vmem:[#allocation2 + $0x60] sm:$0xff] }
 0x402   :  { %v1862_v32 = vpop.eup %1861  ;;  %v1049_v11 = vadd.f32 1.0, %v1860_v2  ;;  %3265 = vst [vmem:[#allocation29_spill] sm:$0xff] %v2846_v53  ;;  %3266 = vst [vmem:[#allocation28_spill] sm:$0xff] %v2849_v54  ;;  %v2855_v2 = vld [vmem:[#allocation2 + $0x48] sm:$0xff] }
 0x403   :  { %1865 = vrcp.f32 %v1048_v5  ;;  %v2852_v5 = vld [vmem:[#allocation2 + $0x70] sm:$0xff]  ;;  %3268 = vst [vmem:[#allocation10_spill] sm:$0xff] %v2855_v2 }
 0x404   :  { %1867 = vrcp.f32 %v1049_v11  ;;  %3267 = vst [vmem:[#allocation30_spill] sm:$0xff] %v2852_v5  ;;  %v2870_v11 = vld [vmem:[#allocation2 + $0x38] sm:$0xff] }
 0x405   :  { %3273 = vst [vmem:[#allocation15_spill] sm:$0xff] %v2870_v11 }
 0x40e   :  { %v1864_v8 = vpop.eup %1863 }
 0x40f   :  { %v1058_v9 = vmul.f32 %v1864_v8, %v1862_v32  ;;  %v2858_v32 = vld [vmem:[#allocation2 + $0x58] sm:$0xff]  ;;  %v2861_v8 = vld [vmem:[#allocation2 + $0x40] sm:$0xff] }
 0x410   :  { %v1866_v10 = vpop.eup %1865  ;;  %3269 = vst [vmem:[#allocation11_spill] sm:$0xff] %v2858_v32  ;;  %3270 = vst [vmem:[#allocation12_spill] sm:$0xff] %v2861_v8 }
 0x411   :  { %v1057_v12 = vmul.f32 %v1866_v10, %v2628_v58  ;;  %v1868_v15 = vpop.eup %1867  ;;  %v2795_v58 = vld [vmem:[#allocation2 + $0xe8] sm:$0xff] }
 0x412   :  { %v2867_v10 = vld [vmem:[#allocation2 + $0x28] sm:$0xff] }
 0x413   :  { %v2750_v13 = vadd.f32 %v1058_v9, %v1057_v12  ;;  %v2864_v9 = vld [vmem:[#allocation2 + $0x50] sm:$0xff]  ;;  %3272 = vst [vmem:[#allocation14_spill] sm:$0xff] %v2867_v10  ;;  %v2873_v12 = vld [vmem:[#allocation2 + $0x20] sm:$0xff] }
 0x414   :  { %3271 = vst [vmem:[#allocation13_spill] sm:$0xff] %v2864_v9  ;;  %3274 = vst [vmem:[#allocation16_spill] sm:$0xff] %v2873_v12 }
 0x415   :  { %1869 = vtanh.f32 %v2750_v13 }
 0x422   :  { %v1870_v16 = vpop.eup %1869 }
 0x423   :  { %v1061_v17 = vmul.f32 %v1870_v16, %v1868_v15  ;;  %v2876_v15 = vld [vmem:[#allocation2 + $0x30] sm:$0xff]  ;;  %v2879_v16 = vld [vmem:[#allocation2 + $0x8] sm:$0xff] }
 0x424   :  { %3275 = vst [vmem:[#allocation17_spill] sm:$0xff] %v2876_v15  ;;  %3276 = vst [vmem:[#allocation18_spill] sm:$0xff] %v2879_v16 }
 0x425   :  { %1127 = vmatmul.mubr.f32.vlgmr.msra.gmra.mxu0 %v1061_v17  ;;  %1198 = vmatmul.mubr.f32.vlgmr.msra.gmra.mxu1 %v1061_v17  ;;  %v2882_v17 = vld [vmem:[#allocation2 + $0x18] sm:$0xff] }
 0x426   :  { %1233 = vmatpush1.msra.mxu0 %v2631_v4  ;;  %1304 = vmatpush1.msra.mxu1 %v2634_v62  ;;  %3277 = vst [vmem:[#allocation19_spill] sm:$0xff] %v2882_v17 }
 0x427   :  { %1234 = vmatprep.subr.mxu0 %v2637_v23  ;;  %1305 = vmatprep.subr.mxu1 %v2640_v60 }
 0x428   :  { %1235 = vmatpush1.msra.mxu0 %v2643_v61  ;;  %1306 = vmatpush1.msra.mxu1 %v2646_v59 }
 0x429   :  { %1236 = vmatprep.subr.mxu0 %v2649_v56  ;;  %1307 = vmatprep.subr.mxu1 %v2652_v1 }
 0x42a   :  { %1237 = vmatpush1.msra.mxu0 %v2655_v55  ;;  %1308 = vmatpush1.msra.mxu1 %v2658_v7 }
 0x42b   :  { %1238 = vmatprep.subr.mxu0 %v2661_v41  ;;  %1309 = vmatprep.subr.mxu1 %v2664_v14 }
 0x42c   :  { %1239 = vmatpush1.msra.mxu0 %v2667_v3  ;;  %1310 = vmatpush1.msra.mxu1 %v2670_v6 }
 0x42d   :  { %1240 = vmatprep.subr.mxu0 %v2673_v57  ;;  %1311 = vmatprep.subr.mxu1 %v2676_v30 }
 0x42e   :  { %1241 = vmatpush1.msra.mxu0 %v3261_v18  ;;  %1312 = vmatpush1.msra.mxu1 %v3262_v19 }
 0x42f   :  { %1242 = vmatprep.subr.mxu0 %v2685_v34  ;;  %1313 = vmatprep.subr.mxu1 %v2688_v50 }
 0x430   :  { %1243 = vmatpush1.msra.mxu0 %v2691_v0  ;;  %1314 = vmatpush1.msra.mxu1 %v2694_v63 }
 0x431   :  { %1244 = vmatprep.subr.mxu0 %v2697_v31  ;;  %1315 = vmatprep.subr.mxu1 %v2700_v33 }
 0x432   :  { %1245 = vmatpush1.msra.mxu0 %v2777_v20  ;;  %1316 = vmatpush1.msra.mxu1 %v2780_v21 }
 0x433   :  { %1246 = vmatprep.subr.mxu0 %v2783_v22  ;;  %1317 = vmatprep.subr.mxu1 %v2786_v24 }
 0x434   :  { %1247 = vmatpush1.msra.mxu0 %v2789_v25  ;;  %1318 = vmatpush1.msra.mxu1 %v2792_v27 }
 0x435   :  { %1248 = vmatprep.subr.mxu0 %v2795_v58  ;;  %1319 = vmatprep.subr.mxu1 %v2798_v35 }
 0x436   :  { %1249 = vmatpush1.msra.mxu0 %v2801_v36  ;;  %1320 = vmatpush1.msra.mxu1 %v2804_v37 }
 0x437   :  { %1250 = vmatprep.subr.mxu0 %v2807_v38  ;;  %1321 = vmatprep.subr.mxu1 %v2810_v39 }
 0x438   :  { %1251 = vmatpush1.msra.mxu0 %v2813_v40  ;;  %1322 = vmatpush1.msra.mxu1 %v2816_v42 }
 0x439   :  { %1252 = vmatprep.subr.mxu0 %v2819_v43  ;;  %1323 = vmatprep.subr.mxu1 %v2822_v44 }
 0x43a   :  { %1253 = vmatpush1.msra.mxu0 %v2825_v45  ;;  %1324 = vmatpush1.msra.mxu1 %v2828_v46 }
 0x43b   :  { %1254 = vmatprep.subr.mxu0 %v2831_v47  ;;  %1325 = vmatprep.subr.mxu1 %v2834_v48 }
 0x43c   :  { %1255 = vmatpush1.msra.mxu0 %v2837_v49  ;;  %1326 = vmatpush1.msra.mxu1 %v2840_v51 }
 0x43d   :  { %1256 = vmatprep.subr.mxu0 %v2843_v52  ;;  %1327 = vmatprep.subr.mxu1 %v2846_v53 }
 0x43e   :  { %1257 = vmatpush1.msra.mxu0 %v2849_v54  ;;  %1328 = vmatpush1.msra.mxu1 %v2852_v5  ;;  %v3282_v5 = vld [vmem:[#allocation40_spill] sm:$0xff] }
 0x43f   :  { %1258 = vmatprep.subr.mxu0 %v2855_v2  ;;  %1329 = vmatprep.subr.mxu1 %v2858_v32 }
 0x440   :  { %1259 = vmatpush1.msra.mxu0 %v2861_v8  ;;  %1330 = vmatpush1.msra.mxu1 %v2864_v9  ;;  %v3281_v8 = vld [vmem:[#allocation41_spill] sm:$0xff] }
 0x441   :  { %1260 = vmatprep.subr.mxu0 %v2867_v10  ;;  %1331 = vmatprep.subr.mxu1 %v2870_v11  ;;  %v2885_v10 = vld [vmem:[#allocation2] sm:$0xff]  ;;  %v2889_v11 = vld [vmem:[#allocation2 + $0x10] sm:$0xff] }
 0x442   :  { %1261 = vmatpush1.msra.mxu0 %v2873_v12  ;;  %1332 = vmatpush1.msra.mxu1 %v2876_v15  ;;  %3278 = vst [vmem:[#allocation20_spill] sm:$0xff] %v2885_v10  ;;  %3279 = vst [vmem:[#allocation21_spill] sm:$0xff] %v2889_v11  ;;  %v3280_v15 = vld [vmem:[#allocation39_spill] sm:$0xff] }
 0x443   :  { %1262 = vmatprep.subr.mxu0 %v2879_v16  ;;  %1333 = vmatprep.subr.mxu1 %v2882_v17 }
 0x444   :  { %1263 = vmatpush1.msra.mxu0 %v2885_v10  ;;  %1296 = vmatprep.mubr.f32.mxu0 %v3247_v26 }
 0x445   :  { %1334 = vmatpush1.msra.mxu1 %v2889_v11  ;;  %1367 = vmatprep.mubr.f32.mxu1 %v3247_v26  ;;  %v3283_v26 = vld [vmem:[#allocation42_spill] sm:$0xff] }
 0x446   :  { %1402 = vmatprep.subr.mxu0 %v2617_v28  ;;  %1473 = vmatprep.subr.mxu1 %v2620_v29 }
 0x4e5   :  { %v1128_v16 = vpop.f32.mrf.mxu0  ;;  %v1199_v2 = vpop.f32.mrf.mxu1 }
 0x4e6   :  { %v1204_v12 = vadd.f32 %v1128_v16, %v3280_v15  ;;  %v1206_v54 = vadd.f32 %v1199_v2, %v3282_v5 }
 0x4e7   :  { %v1130_v17 = vpop.f32.mrf.mxu0  ;;  %v1201_v11 = vpop.f32.mrf.mxu1 }
 0x4e8   :  { %v1789_v9 = vmul.f32 -1.442695, %v1204_v12  ;;  %v1205_v32 = vadd.f32 %v1130_v17, %v3281_v8  ;;  %v1791_v53 = vmul.f32 -1.442695, %v1206_v54  ;;  %v1207_v52 = vadd.f32 %v1201_v11, %v3283_v26  ;;  %v3288_v54 = vld [vmem:[#allocation30_spill] sm:$0xff]  ;;  %v3290_v17 = vld [vmem:[#allocation11_spill] sm:$0xff] }
 0x4e9   :  { %v3289_v11 = vld [vmem:[#allocation10_spill] sm:$0xff] }
 0x4ea   :  { %1871 = vpow2.f32 %v1789_v9  ;;  %v1790_v10 = vmul.f32 -1.442695, %v1205_v32 }
 0x4ec   :  { %1873 = vpow2.f32 %v1790_v10 }
 0x4ed   :  { %1875 = vpow2.f32 %v1791_v53 }
 0x4ee   :  { %1877 = vtanh.f32 %v1207_v52  ;;  %v3287_v52 = vld [vmem:[#allocation28_spill] sm:$0xff] }
 0x4f7   :  { %v1872_v28 = vpop.eup %1871 }
 0x4f8   :  { %v1217_v51 = vadd.f32 1.0, %v1872_v28 }
 0x4f9   :  { %v1874_v29 = vpop.eup %1873 }
 0x4fa   :  { %1879 = vrcp.f32 %v1217_v51  ;;  %v1218_v15 = vadd.f32 1.0, %v1874_v29  ;;  %v1876_v12 = vpop.eup %1875  ;;  %v3284_v29 = vld [vmem:[#allocation6_spill] sm:$0xff]  ;;  %v3286_v51 = vld [vmem:[#allocation29_spill] sm:$0xff] }
 0x4fb   :  { %v1878_v8 = vpop.eup %1877  ;;  %v1219_v16 = vadd.f32 1.0, %v1876_v12  ;;  %v3292_v12 = vld [vmem:[#allocation13_spill] sm:$0xff] }
 0x4fc   :  { %1881 = vrcp.f32 %v1218_v15  ;;  %v3291_v15 = vld [vmem:[#allocation12_spill] sm:$0xff] }
 0x4fd   :  { %1883 = vrcp.f32 %v1219_v16  ;;  %v3297_v16 = vld [vmem:[#allocation18_spill] sm:$0xff] }
 0x507   :  { %v1880_v9 = vpop.eup %1879 }
 0x508   :  { %v1228_v32 = vmul.f32 %v1880_v9, %v1878_v8  ;;  %v3293_v8 = vld [vmem:[#allocation14_spill] sm:$0xff]  ;;  %v3294_v9 = vld [vmem:[#allocation15_spill] sm:$0xff] }
 0x509   :  { %v1882_v10 = vpop.eup %1881 }
 0x50a   :  { %v1227_v5 = vmul.f32 %v1882_v10, %v2750_v13  ;;  %v1884_v26 = vpop.eup %1883  ;;  %v3285_v13 = vld [vmem:[#allocation27_spill] sm:$0xff]  ;;  %v3296_v10 = vld [vmem:[#allocation17_spill] sm:$0xff] }
 0x50c   :  { %v2900_v2 = vadd.f32 %v1228_v32, %v1227_v5  ;;  %v3295_v32 = vld [vmem:[#allocation16_spill] sm:$0xff]  ;;  %v3298_v5 = vld [vmem:[#allocation19_spill] sm:$0xff] }
 0x50e   :  { %1885 = vtanh.f32 %v2900_v2 }
 0x51b   :  { %v1886_v28 = vpop.eup %1885 }
 0x51c   :  { %v1231_v53 = vmul.f32 %v1886_v28, %v1884_v26  ;;  %v3299_v26 = vld [vmem:[#allocation20_spill] sm:$0xff]  ;;  %v3300_v28 = vmov 0.0  }
 0x51e   :  { %1297 = vmatmul.mubr.f32.vlgmr.msra.gmra.mxu0 %v1231_v53  ;;  %1368 = vmatmul.mubr.f32.vlgmr.msra.gmra.mxu1 %v1231_v53  ;;  %v3301_v53 = vld [vmem:[#allocation21_spill] sm:$0xff] }
 0x51f   :  { %1403 = vmatpush1.msra.mxu0 %v2631_v4  ;;  %1474 = vmatpush1.msra.mxu1 %v2634_v62 }
 0x520   :  { %1404 = vmatprep.subr.mxu0 %v2637_v23  ;;  %1475 = vmatprep.subr.mxu1 %v2640_v60 }
 0x521   :  { %1405 = vmatpush1.msra.mxu0 %v2643_v61  ;;  %1476 = vmatpush1.msra.mxu1 %v2646_v59 }
 0x522   :  { %1406 = vmatprep.subr.mxu0 %v2649_v56  ;;  %1477 = vmatprep.subr.mxu1 %v2652_v1 }
 0x523   :  { %1407 = vmatpush1.msra.mxu0 %v2655_v55  ;;  %1478 = vmatpush1.msra.mxu1 %v2658_v7 }
 0x524   :  { %1408 = vmatprep.subr.mxu0 %v2661_v41  ;;  %1479 = vmatprep.subr.mxu1 %v2664_v14 }
 0x525   :  { %1409 = vmatpush1.msra.mxu0 %v2667_v3  ;;  %1480 = vmatpush1.msra.mxu1 %v2670_v6 }
 0x526   :  { %1410 = vmatprep.subr.mxu0 %v2673_v57  ;;  %1481 = vmatprep.subr.mxu1 %v2676_v30 }
 0x527   :  { %1411 = vmatpush1.msra.mxu0 %v3261_v18  ;;  %1482 = vmatpush1.msra.mxu1 %v3262_v19 }
 0x528   :  { %1412 = vmatprep.subr.mxu0 %v2685_v34  ;;  %1483 = vmatprep.subr.mxu1 %v2688_v50 }
 0x529   :  { %1413 = vmatpush1.msra.mxu0 %v2691_v0  ;;  %1484 = vmatpush1.msra.mxu1 %v2694_v63 }
 0x52a   :  { %1414 = vmatprep.subr.mxu0 %v2697_v31  ;;  %1485 = vmatprep.subr.mxu1 %v2700_v33 }
 0x52b   :  { %1415 = vmatpush1.msra.mxu0 %v2777_v20  ;;  %1486 = vmatpush1.msra.mxu1 %v2780_v21 }
 0x52c   :  { %1416 = vmatprep.subr.mxu0 %v2783_v22  ;;  %1487 = vmatprep.subr.mxu1 %v2786_v24 }
 0x52d   :  { %1417 = vmatpush1.msra.mxu0 %v2789_v25  ;;  %1488 = vmatpush1.msra.mxu1 %v2792_v27 }
 0x52e   :  { %1418 = vmatprep.subr.mxu0 %v2795_v58  ;;  %1489 = vmatprep.subr.mxu1 %v2798_v35 }
 0x52f   :  { %1419 = vmatpush1.msra.mxu0 %v2801_v36  ;;  %1490 = vmatpush1.msra.mxu1 %v2804_v37 }
 0x530   :  { %1420 = vmatprep.subr.mxu0 %v2807_v38  ;;  %1491 = vmatprep.subr.mxu1 %v2810_v39 }
 0x531   :  { %1421 = vmatpush1.msra.mxu0 %v2813_v40  ;;  %1492 = vmatpush1.msra.mxu1 %v2816_v42 }
 0x532   :  { %1422 = vmatprep.subr.mxu0 %v2819_v43  ;;  %1493 = vmatprep.subr.mxu1 %v2822_v44 }
 0x533   :  { %1423 = vmatpush1.msra.mxu0 %v2825_v45  ;;  %1494 = vmatpush1.msra.mxu1 %v2828_v46 }
 0x534   :  { %1424 = vmatprep.subr.mxu0 %v2831_v47  ;;  %1495 = vmatprep.subr.mxu1 %v2834_v48 }
 0x535   :  { %1425 = vmatpush1.msra.mxu0 %v2837_v49  ;;  %1496 = vmatpush1.msra.mxu1 %v3284_v29 }
 0x536   :  { %1426 = vmatprep.subr.mxu0 %v3285_v13  ;;  %1497 = vmatprep.subr.mxu1 %v3286_v51 }
 0x537   :  { %1427 = vmatpush1.msra.mxu0 %v3287_v52  ;;  %1498 = vmatpush1.msra.mxu1 %v3288_v54  ;;  %v3306_v54 = vld [vmem:[#allocation44_spill] sm:$0xff] }
 0x538   :  { %1428 = vmatprep.subr.mxu0 %v3289_v11  ;;  %1499 = vmatprep.subr.mxu1 %v3290_v17 }
 0x539   :  { %1429 = vmatpush1.msra.mxu0 %v3291_v15  ;;  %1500 = vmatpush1.msra.mxu1 %v3292_v12  ;;  %v3302_v12 = vld [vmem:[#allocation7_spill] sm:$0xff] }
 0x53a   :  { %1430 = vmatprep.subr.mxu0 %v3293_v8  ;;  %1501 = vmatprep.subr.mxu1 %v3294_v9  ;;  %v3303_v8 = vld [vmem:[#allocation8_spill] sm:$0xff] }
 0x53b   :  { %1431 = vmatpush1.msra.mxu0 %v3295_v32  ;;  %1502 = vmatpush1.msra.mxu1 %v3296_v10  ;;  %v3304_v32 = vld [vmem:[#allocation43_spill] sm:$0xff] }
 0x53c   :  { %1432 = vmatprep.subr.mxu0 %v3297_v16  ;;  %1503 = vmatprep.subr.mxu1 %v3298_v5  ;;  %v3305_v16 = vld [vmem:[#allocation45_spill] sm:$0xff] }
 0x53d   :  { %1433 = vmatpush1.msra.mxu0 %v3299_v26  ;;  %1466 = vmatprep.mubr.f32.mxu0 %v3300_v28 }
 0x53e   :  { %1504 = vmatpush1.msra.mxu1 %v3301_v53  ;;  %1537 = vmatprep.mubr.f32.mxu1 %v3300_v28  ;;  %v3307_v28 = vld [vmem:[#allocation46_spill] sm:$0xff] }
 0x53f   :  { %1572 = vmatprep.subr.mxu0 %v3302_v12  ;;  %1643 = vmatprep.subr.mxu1 %v3303_v8 }
 0x5de   :  { %v1298_v9 = vpop.f32.mrf.mxu0  ;;  %v1369_v26 = vpop.f32.mrf.mxu1 }
 0x5df   :  { %v1374_v15 = vadd.f32 %v1298_v9, %v3304_v32  ;;  %v1376_v52 = vadd.f32 %v1369_v26, %v3306_v54 }
 0x5e0   :  { %v1300_v10 = vpop.f32.mrf.mxu0  ;;  %v1371_v53 = vpop.f32.mrf.mxu1 }
 0x5e1   :  { %v1792_v17 = vmul.f32 -1.442695, %v1374_v15  ;;  %v1375_v11 = vadd.f32 %v1300_v10, %v3305_v16  ;;  %v1794_v51 = vmul.f32 -1.442695, %v1376_v52  ;;  %v1377_v13 = vadd.f32 %v1371_v53, %v3307_v28  ;;  %v3330_v53 = vld [vmem:[#allocation51_spill] sm:$0xff] }
 0x5e3   :  { %1887 = vpow2.f32 %v1792_v17  ;;  %v1793_v5 = vmul.f32 -1.442695, %v1375_v11 }
 0x5e5   :  { %1889 = vpow2.f32 %v1793_v5 }
 0x5e6   :  { %1891 = vpow2.f32 %v1794_v51 }
 0x5e7   :  { %1893 = vtanh.f32 %v1377_v13 }
 0x5f0   :  { %v1888_v12 = vpop.eup %1887 }
 0x5f1   :  { %v1387_v29 = vadd.f32 1.0, %v1888_v12 }
 0x5f2   :  { %v1890_v8 = vpop.eup %1889 }
 0x5f3   :  { %1895 = vrcp.f32 %v1387_v29  ;;  %v1388_v9 = vadd.f32 1.0, %v1890_v8  ;;  %v1892_v15 = vpop.eup %1891 }
 0x5f4   :  { %v1894_v32 = vpop.eup %1893  ;;  %v1389_v16 = vadd.f32 1.0, %v1892_v15  ;;  %v3331_v15 = vld [vmem:[#allocation53_spill] sm:$0xff] }
 0x5f5   :  { %1897 = vrcp.f32 %v1388_v9 }
 0x5f6   :  { %1899 = vrcp.f32 %v1389_v16 }
 0x600   :  { %v1896_v17 = vpop.eup %1895 }
 0x601   :  { %v1398_v11 = vmul.f32 %v1896_v17, %v1894_v32 }
 0x602   :  { %v1898_v10 = vpop.eup %1897 }
 0x603   :  { %v1397_v54 = vmul.f32 %v1898_v10, %v2900_v2  ;;  %v1900_v52 = vpop.eup %1899  ;;  %v3332_v10 = vld [vmem:[#allocation52_spill] sm:$0xff] }
 0x605   :  { %v2974_v5 = vadd.f32 %v1398_v11, %v1397_v54 }
 0x607   :  { %1901 = vtanh.f32 %v2974_v5 }
 0x614   :  { %v1902_v51 = vpop.eup %1901 }
 0x615   :  { %v1401_v26 = vmul.f32 %v1902_v51, %v1900_v52  ;;  %v3333_v52 = vld [vmem:[#allocation54_spill] sm:$0xff] }
 0x617   :  { %1467 = vmatmul.mubr.f32.vlgmr.msra.gmra.mxu0 %v1401_v26  ;;  %1538 = vmatmul.mubr.f32.vlgmr.msra.gmra.mxu1 %v1401_v26 }
 0x618   :  { %1573 = vmatpush1.msra.mxu0 %v2631_v4  ;;  %1644 = vmatpush1.msra.mxu1 %v2634_v62  ;;  %v3308_v4 = vld [vmem:[#allocation6_spill] sm:$0xff]  ;;  %v3309_v62 = vld [vmem:[#allocation27_spill] sm:$0xff] }
 0x619   :  { %1574 = vmatprep.subr.mxu0 %v2637_v23  ;;  %1645 = vmatprep.subr.mxu1 %v2640_v60  ;;  %v3310_v23 = vld [vmem:[#allocation29_spill] sm:$0xff]  ;;  %v3311_v60 = vld [vmem:[#allocation28_spill] sm:$0xff] }
 0x61a   :  { %1575 = vmatpush1.msra.mxu0 %v2643_v61  ;;  %1646 = vmatpush1.msra.mxu1 %v2646_v59  ;;  %v3312_v61 = vld [vmem:[#allocation30_spill] sm:$0xff] }
 0x61b   :  { %1576 = vmatprep.subr.mxu0 %v2649_v56  ;;  %1647 = vmatprep.subr.mxu1 %v2652_v1  ;;  %v3313_v59 = vld [vmem:[#allocation10_spill] sm:$0xff]  ;;  %v3314_v56 = vld [vmem:[#allocation11_spill] sm:$0xff]  ;;  %v3315_v1 = vld [vmem:[#allocation12_spill] sm:$0xff] }
 0x61c   :  { %1577 = vmatpush1.msra.mxu0 %v2655_v55  ;;  %1648 = vmatpush1.msra.mxu1 %v2658_v7  ;;  %v3316_v55 = vld [vmem:[#allocation13_spill] sm:$0xff]  ;;  %v3317_v7 = vld [vmem:[#allocation14_spill] sm:$0xff] }
 0x61d   :  { %1578 = vmatprep.subr.mxu0 %v2661_v41  ;;  %1649 = vmatprep.subr.mxu1 %v2664_v14  ;;  %v3318_v41 = vld [vmem:[#allocation15_spill] sm:$0xff]  ;;  %v3319_v14 = vld [vmem:[#allocation16_spill] sm:$0xff] }
 0x61e   :  { %1579 = vmatpush1.msra.mxu0 %v2667_v3  ;;  %1650 = vmatpush1.msra.mxu1 %v2670_v6  ;;  %v3320_v3 = vld [vmem:[#allocation17_spill] sm:$0xff]  ;;  %v3321_v6 = vld [vmem:[#allocation18_spill] sm:$0xff] }
 0x61f   :  { %1580 = vmatprep.subr.mxu0 %v2673_v57  ;;  %1651 = vmatprep.subr.mxu1 %v2676_v30  ;;  %v3322_v57 = vld [vmem:[#allocation19_spill] sm:$0xff]  ;;  %v3323_v30 = vld [vmem:[#allocation20_spill] sm:$0xff] }
 0x620   :  { %1581 = vmatpush1.msra.mxu0 %v3261_v18  ;;  %1652 = vmatpush1.msra.mxu1 %v3262_v19  ;;  %v3327_v19 = vld [vmem:[#allocation49_spill] sm:$0xff] }
 0x621   :  { %1582 = vmatprep.subr.mxu0 %v2685_v34  ;;  %1653 = vmatprep.subr.mxu1 %v2688_v50  ;;  %v3326_v50 = vld [vmem:[#allocation47_spill] sm:$0xff] }
 0x622   :  { %1583 = vmatpush1.msra.mxu0 %v2691_v0  ;;  %1654 = vmatpush1.msra.mxu1 %v2694_v63 }
 0x623   :  { %1584 = vmatprep.subr.mxu0 %v2697_v31  ;;  %1655 = vmatprep.subr.mxu1 %v2700_v33  ;;  %v3324_v31 = vmov 0.0   ;;  %v3325_v33 = vld [vmem:[#allocation21_spill] sm:$0xff] }
 0x624   :  { %1585 = vmatpush1.msra.mxu0 %v2777_v20  ;;  %1656 = vmatpush1.msra.mxu1 %v2780_v21 }
 0x625   :  { %1586 = vmatprep.subr.mxu0 %v2783_v22  ;;  %1657 = vmatprep.subr.mxu1 %v2786_v24  ;;  %v3328_v24 = vld [vmem:[#allocation48_spill] sm:$0xff] }
 0x626   :  { %1587 = vmatpush1.msra.mxu0 %v2789_v25  ;;  %1658 = vmatpush1.msra.mxu1 %v2792_v27 }
 0x627   :  { %1588 = vmatprep.subr.mxu0 %v2795_v58  ;;  %1659 = vmatprep.subr.mxu1 %v2798_v35  ;;  %v3329_v35 = vld [vmem:[#allocation50_spill] sm:$0xff] }
 0x628   :  { %1589 = vmatpush1.msra.mxu0 %v2801_v36  ;;  %1660 = vmatpush1.msra.mxu1 %v2804_v37 }
 0x629   :  { %1590 = vmatprep.subr.mxu0 %v2807_v38  ;;  %1661 = vmatprep.subr.mxu1 %v2810_v39 }
 0x62a   :  { %1591 = vmatpush1.msra.mxu0 %v2813_v40  ;;  %1662 = vmatpush1.msra.mxu1 %v2816_v42 }
 0x62b   :  { %1592 = vmatprep.subr.mxu0 %v2819_v43  ;;  %1663 = vmatprep.subr.mxu1 %v2822_v44 }
 0x62c   :  { %1593 = vmatpush1.msra.mxu0 %v2825_v45  ;;  %1664 = vmatpush1.msra.mxu1 %v2828_v46 }
 0x62d   :  { %1594 = vmatprep.subr.mxu0 %v2831_v47  ;;  %1665 = vmatprep.subr.mxu1 %v2834_v48 }
 0x62e   :  { %1595 = vmatpush1.msra.mxu0 %v2837_v49  ;;  %1666 = vmatpush1.msra.mxu1 %v3308_v4 }
 0x62f   :  { %1596 = vmatprep.subr.mxu0 %v3309_v62  ;;  %1667 = vmatprep.subr.mxu1 %v3310_v23 }
 0x630   :  { %1597 = vmatpush1.msra.mxu0 %v3311_v60  ;;  %1668 = vmatpush1.msra.mxu1 %v3312_v61 }
 0x631   :  { %1598 = vmatprep.subr.mxu0 %v3313_v59  ;;  %1669 = vmatprep.subr.mxu1 %v3314_v56 }
 0x632   :  { %1599 = vmatpush1.msra.mxu0 %v3315_v1  ;;  %1670 = vmatpush1.msra.mxu1 %v3316_v55 }
 0x633   :  { %1600 = vmatprep.subr.mxu0 %v3317_v7  ;;  %1671 = vmatprep.subr.mxu1 %v3318_v41 }
 0x634   :  { %1601 = vmatpush1.msra.mxu0 %v3319_v14  ;;  %1672 = vmatpush1.msra.mxu1 %v3320_v3 }
 0x635   :  { %1602 = vmatprep.subr.mxu0 %v3321_v6  ;;  %1673 = vmatprep.subr.mxu1 %v3322_v57  ;;  %v1801_v6 = vld [vmem:[%s3062_s3 + $0x1] ss:$0 sm:$0xff] }
 0x636   :  { %1603 = vmatpush1.msra.mxu0 %v3323_v30  ;;  %1636 = vmatprep.mubr.f32.mxu0 %v3324_v31 }
 0x637   :  { %1674 = vmatpush1.msra.mxu1 %v3325_v33  ;;  %1707 = vmatprep.mubr.f32.mxu1 %v3324_v31  ;;  %v1802_v31 = vld [vmem:[%s3062_s3 + $0x3] ss:$0 sm:$0xff] }
 0x6d7   :  { %v1468_v34 = vpop.f32.mrf.mxu0  ;;  %v1539_v22 = vpop.f32.mrf.mxu1 }
 0x6d8   :  { %v1544_v0 = vadd.f32 %v1468_v34, %v3326_v50  ;;  %v1546_v25 = vadd.f32 %v1539_v22, %v3328_v24 }
 0x6d9   :  { %v1470_v63 = vpop.f32.mrf.mxu0  ;;  %v1541_v27 = vpop.f32.mrf.mxu1 }
 0x6da   :  { %v1795_v18 = vmul.f32 -1.442695, %v1544_v0  ;;  %v1545_v20 = vadd.f32 %v1470_v63, %v3327_v19  ;;  %v1797_v58 = vmul.f32 -1.442695, %v1546_v25  ;;  %v1547_v36 = vadd.f32 %v1541_v27, %v3329_v35 }
 0x6dc   :  { %1903 = vpow2.f32 %v1795_v18  ;;  %v1796_v21 = vmul.f32 -1.442695, %v1545_v20 }
 0x6de   :  { %1905 = vpow2.f32 %v1796_v21 }
 0x6df   :  { %1907 = vpow2.f32 %v1797_v58 }
 0x6e0   :  { %1909 = vtanh.f32 %v1547_v36 }
 0x6e9   :  { %v1904_v37 = vpop.eup %1903 }
 0x6ea   :  { %v1557_v38 = vadd.f32 1.0, %v1904_v37 }
 0x6eb   :  { %v1906_v39 = vpop.eup %1905 }
 0x6ec   :  { %1911 = vrcp.f32 %v1557_v38  ;;  %v1558_v40 = vadd.f32 1.0, %v1906_v39  ;;  %v1908_v42 = vpop.eup %1907 }
 0x6ed   :  { %v1910_v43 = vpop.eup %1909  ;;  %v1559_v47 = vadd.f32 1.0, %v1908_v42 }
 0x6ee   :  { %1913 = vrcp.f32 %v1558_v40 }
 0x6ef   :  { %1915 = vrcp.f32 %v1559_v47 }
 0x6f9   :  { %v1912_v44 = vpop.eup %1911 }
 0x6fa   :  { %v1568_v45 = vmul.f32 %v1912_v44, %v1910_v43 }
 0x6fb   :  { %v1914_v46 = vpop.eup %1913 }
 0x6fc   :  { %v1567_v48 = vmul.f32 %v1914_v46, %v2974_v5  ;;  %v1916_v2 = vpop.eup %1915 }
 0x6fe   :  { %v1569_v49 = vadd.f32 %v1568_v45, %v1567_v48 }
 0x700   :  { %1917 = vtanh.f32 %v1569_v49 }
 0x70d   :  { %v1918_v29 = vpop.eup %1917 }
 0x70e   :  { %v1571_v13 = vmul.f32 %v1918_v29, %v1916_v2 }
 0x710   :  { %1637 = vmatmul.mubr.f32.vlgmr.msra.gmra.mxu0 %v1571_v13  ;;  %1708 = vmatmul.mubr.f32.vlgmr.msra.gmra.mxu1 %v1571_v13 }
 0x7d0   :  { %v1638_v28 = vpop.f32.mrf.mxu0  ;;  %v1709_v11 = vpop.f32.mrf.mxu1 }
 0x7d1   :  { %v1714_v12 = vadd.f32 %v1638_v28, %v3330_v53  ;;  %v1716_v16 = vadd.f32 %v1709_v11, %v3332_v10 }
 0x7d2   :  { %v1640_v8 = vpop.f32.mrf.mxu0  ;;  %v1711_v54 = vpop.f32.mrf.mxu1 }
 0x7d3   :  { %v1798_v9 = vmul.f32 -1.442695, %v1714_v12  ;;  %v1715_v32 = vadd.f32 %v1640_v8, %v3331_v15  ;;  %v1800_v5 = vmul.f32 -1.442695, %v1716_v16  ;;  %v1717_v51 = vadd.f32 %v1711_v54, %v3333_v52 }
 0x7d5   :  { %1919 = vpow2.f32 %v1798_v9  ;;  %v1799_v17 = vmul.f32 -1.442695, %v1715_v32 }
 0x7d7   :  { %1921 = vpow2.f32 %v1799_v17 }
 0x7d8   :  { %1923 = vpow2.f32 %v1800_v5 }
 0x7d9   :  { %1925 = vtanh.f32 %v1717_v51 }
 0x7e2   :  { %v1920_v26 = vpop.eup %1919 }
 0x7e3   :  { %v1727_v4 = vadd.f32 1.0, %v1920_v26 }
 0x7e4   :  { %v1922_v62 = vpop.eup %1921 }
 0x7e5   :  { %1927 = vrcp.f32 %v1727_v4  ;;  %v1728_v23 = vadd.f32 1.0, %v1922_v62  ;;  %v1924_v60 = vpop.eup %1923 }
 0x7e6   :  { %v1926_v61 = vpop.eup %1925  ;;  %v1729_v55 = vadd.f32 1.0, %v1924_v60 }
 0x7e7   :  { %1929 = vrcp.f32 %v1728_v23 }
 0x7e8   :  { %1931 = vrcp.f32 %v1729_v55 }
 0x7f2   :  { %v1928_v59 = vpop.eup %1927 }
 0x7f3   :  { %v1738_v56 = vmul.f32 %v1928_v59, %v1926_v61 }
 0x7f4   :  { %v1930_v1 = vpop.eup %1929 }
 0x7f5   :  { %v1737_v7 = vmul.f32 %v1930_v1, %v1569_v49  ;;  %v1932_v14 = vpop.eup %1931 }
 0x7f7   :  { %v1739_v41 = vadd.f32 %v1738_v56, %v1737_v7 }
 0x7f9   :  { %1933 = vtanh.f32 %v1739_v41 }
 0x806   :  { %v1934_v3 = vpop.eup %1933 }
 0x807   :  { %v1741_v57 = vmul.f32 %v1934_v3, %v1932_v14 }
 0x809   :  { %v1746_v30 = vmul.f32 %v1801_v6, %v1741_v57 }
 0x80b   :  { %1747 = vadd.xlane.f32.xlu0 %v1746_v30 }
 0x894   :  { %v1748_v33 = vpop.xlane.xlu0 %1747 }
 0x895   :  { %v1753_v34 = vadd.f32 %v1802_v31, %v1748_v33 }
 0x897   :  { %1755 = vst.msk [vmem:[%s3063_s4] sm:$0xff] %vm1754_vm1, %v1753_v34 }
 0x898   :  { %1760 = vsyncpa [#allocation3], 1 }

</bundles_post_ra>
